<compile_context>
chip_gen: v7x
topology: tpu7x:2x2x1
jax: 0.10.0
libtpu: 0.0.40
codegen_flags: <defaults>
</compile_context>

<pallas_src>
import functools

import jax
import jax.numpy as jnp
from jax import lax
from jax.experimental import pallas as pl
from jax.experimental.pallas import tpu as pltpu

# ----------------------------- configuration --------------------------------
DIM = 32          # channels C (== dim)
NUM_HEADS = 4
HEAD_DIM = DIM // NUM_HEADS
SCALE = 0.125     # fixed in the reference module
V_TH = 1.0        # ParametricLIFNode default v_threshold
LIF_DECAY = 0.5   # sigmoid(w) for default init_tau = 2.0
BN_EPS = 1e-5


# ------------------------------- kernel -------------------------------------
def _ssa_kernel(x_ref, wqkv_ref, sqkv_ref, wp_ref, bp_ref, mh_ref, o_ref,
                vqkv, vattn, vproj, *, C, N, BP, T, L, kv_bf16):
    # Fresh sequence for this batch group: reset all LIF membrane potentials.
    vqkv[...] = jnp.zeros_like(vqkv)
    vattn[...] = jnp.zeros_like(vattn)
    vproj[...] = jnp.zeros_like(vproj)

    # ---- loop invariants (hoisted out of the t loop) ----
    wqkv = wqkv_ref[...]                                     # (3C, C)   f32
    wp = wp_ref[...]                                         # (C, C)    f32
    sqkv = jnp.broadcast_to(sqkv_ref[...], (3 * C, L))       # (3C, L)   f32
    bpb = jnp.broadcast_to(bp_ref[...], (C, L))              # (C, L)    f32
    mh = mh_ref[...]                                         # (C, BP*C) f32 (head blockdiag * 0.125)

    if BP > 1:
        # {0,1} lane masks selecting each packed batch element's lanes.
        lane = lax.broadcasted_iota(jnp.int32, (BP, 1, L), 2)
        bidx = lax.broadcasted_iota(jnp.int32, (BP, 1, L), 0)
        lo = bidx * N
        sel = jnp.logical_and(lane >= lo, lane < lo + N).astype(jnp.bfloat16)
    else:
        sel = None

    def lif(x, v_ref, out_dtype):
        """ParametricLIFNode step: decay_input=True, hard reset to 0."""
        v = v_ref[...]
        h = v + (x - v) * LIF_DECAY
        spk = h >= V_TH
        v_ref[...] = jnp.where(spk, 0.0, h)
        return spk.astype(out_dtype)

    def step(t, carry):
        x = x_ref[t]                                                    # (C, L) f32

        # Fused q/k/v projection (BN folded) + ONE LIF step for all branches.
        y = jnp.dot(wqkv, x, preferred_element_type=jnp.float32) + sqkv
        qkv_s = lif(y, vqkv, jnp.bfloat16)                              # (3C, L) {0,1}
        q = qkv_s[0 * C:1 * C]
        k = qkv_s[1 * C:2 * C]
        v = qkv_s[2 * C:3 * C]

        # Stacked, lane-masked copies: row b*C + c holds batch b's channel c.
        if BP > 1:
            k_st = (k[None, :, :] * sel).reshape(BP * C, L)             # (BP*C, L)
            q_st = (q[None, :, :] * sel).reshape(BP * C, L)
        else:
            k_st, q_st = k, q

        # kv[a, b*C + c] = sum_{lanes of batch b} v[a, l] * k[c, l]
        kv = lax.dot_general(v, k_st, (((1,), (1,)), ((), ())),
                             preferred_element_type=jnp.float32)        # (C, BP*C)
        kv = kv * mh                                                    # head blockdiag * 0.125
        if kv_bf16:
            # exact: spike counts <= N <= 256 scaled by a power of two.
            kv = kv.astype(jnp.bfloat16)
            attn = jnp.dot(kv, q_st, preferred_element_type=jnp.float32)   # (C, L)
        else:
            attn = jnp.dot(kv, q_st.astype(jnp.float32),
                           preferred_element_type=jnp.float32)

        attn_s = lif(attn, vattn, jnp.float32)                          # attn_lif

        # proj conv(+bias)+BN folded, then proj_lif; store bf16 spikes.
        y2 = jnp.dot(wp, attn_s, preferred_element_type=jnp.float32) + bpb
        o_ref[t] = lif(y2, vproj, o_ref.dtype)
        return carry

    lax.fori_loop(0, T, step, 0, unroll=T <= 8)


# ------------------------------- wrapper -------------------------------------
def _pick_bp(B, N):
    """Lane-packing factor BP (divides B): maximize L = BP*N up to 2048 lanes,
    backing off (only when L stays >= 512) so BG = B//BP >= 2 and v7x's two
    TensorCores both get work via the 'parallel' bg axis."""
    divs = [d for d in range(1, B + 1) if B % d == 0]
    fit = [d for d in divs if d * N <= 2048] or [1]
    bp = max(fit)
    if B // bp < 2:
        alt = [d for d in fit if B // d >= 2 and d * N >= 512]
        if alt:
            bp = max(alt)
    return bp


def spiking_self_attention(x, params):
    """x: (T, B, C, H, W) float32 -> (T, B, C, W, H) float32 (as in the module)."""
    T, B, C, H, W = x.shape
    assert C == DIM and C % NUM_HEADS == 0
    N = H * W
    BP = _pick_bp(B, N)
    BG = B // BP
    L = BP * N   # NOTE: L < 128 (tiny B*N) still compiles but is lane-sparse.

    # (T, B, C, H, W) -> (BG, T, C, L): lane l = bp*N + n for batch b = bg*BP + bp.
    # The (BG, T, C, L) ordering makes each grid step's (T, C, L) block one
    # contiguous HBM slab.
    xf = (x.reshape(T, BG, BP, C, N)
           .transpose(1, 0, 3, 2, 4)
           .reshape(BG, T, C, L))
    # TODO(synk): between stacked QKFormer blocks keep activations in this packed
    #             (BG, T, C, L) layout to avoid repeated pack/unpack HBM passes.

    # Fold eval-mode BatchNorm into weights / shifts; stack q, k, v weights.
    wqkv = jnp.concatenate([params["q_scale"] * params["wq"],
                            params["k_scale"] * params["wk"],
                            params["v_scale"] * params["wv"]], axis=0)   # (3C, C)
    sqkv = jnp.concatenate([params["q_shift"], params["k_shift"],
                            params["v_shift"]], axis=0)                  # (3C, 1)
    wp_f = params["p_scale"] * params["wp"]                              # (C, C)
    bp_f = params["p_scale"] * params["bp"] + params["p_shift"]          # (C, 1)

    # Head block-diagonal mask, pre-scaled by 0.125, tiled per packed batch.
    head = jnp.arange(C) // HEAD_DIM
    blk = (head[:, None] == head[None, :]).astype(jnp.float32) * SCALE   # (C, C)
    mh = jnp.tile(blk, (1, BP))                                          # (C, BP*C)

    C3 = 3 * C
    kernel = functools.partial(_ssa_kernel, C=C, N=N, BP=BP, T=T, L=L,
                               kv_bf16=(N <= 256))
    const2 = lambda bg: (0, 0)
    xio_spec = pl.BlockSpec((None, T, C, L), lambda bg: (bg, 0, 0, 0))

    out = pl.pallas_call(
        kernel,
        out_shape=jax.ShapeDtypeStruct((BG, T, C, L), jnp.bfloat16),
        grid_spec=pltpu.PrefetchScalarGridSpec(
            num_scalar_prefetch=0,
            grid=(BG,),
            in_specs=[
                xio_spec,                               # x     (BG, T, C, L)
                pl.BlockSpec((C3, C), const2),          # Wqkv  (BN-scaled)
                pl.BlockSpec((C3, 1), const2),          # qkv BN shifts
                pl.BlockSpec((C, C), const2),           # Wproj (BN-scaled)
                pl.BlockSpec((C, 1), const2),           # proj bias+shift
                pl.BlockSpec((C, BP * C), const2),      # tiled head mask * 0.125
            ],
            out_specs=xio_spec,
            scratch_shapes=[pltpu.VMEM((C3, L), jnp.float32),   # q/k/v membranes
                            pltpu.VMEM((C, L), jnp.float32),    # attn membrane
                            pltpu.VMEM((C, L), jnp.float32)],   # proj membrane
        ),
        compiler_params=pltpu.CompilerParams(
            dimension_semantics=("parallel",)),
    )(xf, wqkv, sqkv, wp_f, bp_f, mh)

    # Undo the lane packing, widen the {0,1} spikes to f32, and match the
    # reference's final reshape (T, B, C, W, H) — a pure relabel of N.
    out = (out.reshape(BG, T, C, BP, N)
              .transpose(1, 0, 3, 2, 4)
              .reshape(T, B, C, N)
              .astype(jnp.float32))
    return out.reshape(T, B, C, W, H)


# ---------------------- pure-JAX reference (for checking) --------------------
def _reference(x, params):
    T, B, C, H, W = x.shape
    N = H * W
    NH, D = NUM_HEADS, HEAD_DIM
    xf = x.reshape(T, B, C, N)
    prec = jax.lax.Precision.HIGHEST

    def lif_scan(inp):                       # inp: (T, B, C, N)
        def stp(v, xt):
            h = v + (xt - v) * LIF_DECAY
            s = (h >= V_TH).astype(jnp.float32)
            return h * (1.0 - s), s
        _, out = lax.scan(stp, jnp.zeros_like(inp[0]), inp)
        return out

    def branch(w, scale, shift):
        y = jnp.einsum('oc,tbcn->tbon', scale * w, xf, precision=prec)
        return lif_scan(y + shift[None, None])

    q = branch(params["wq"], params["q_scale"], params["q_shift"])
    k = branch(params["wk"], params["k_scale"], params["k_shift"])
    v = branch(params["wv"], params["v_scale"], params["v_shift"])

    qh = q.reshape(T, B, NH, D, N)
    kh = k.reshape(T, B, NH, D, N)
    vh = v.reshape(T, B, NH, D, N)
    kv = jnp.einsum('tbhin,tbhjn->tbhij', kh, vh, precision=prec)
    attn = jnp.einsum('tbhij,tbhin->tbhjn', kv, qh, precision=prec) * SCALE
    attn_s = lif_scan(attn.reshape(T, B, C, N))

    wp_f = params["p_scale"] * params["wp"]
    bp_f = params["p_scale"] * params["bp"] + params["p_shift"]
    y2 = jnp.einsum('oc,tbcn->tbon', wp_f, attn_s, precision=prec)
    out = lif_scan(y2 + bp_f[None, None])
    return out.reshape(T, B, C, W, H)


# --------------------------- parameter creation -------------------------------
def _fold_bn(key):
    kg, kb, km, kv = jax.random.split(key, 4)
    gamma = 1.0 + 0.1 * jax.random.normal(kg, (DIM, 1), jnp.float32)
    beta = 0.1 * jax.random.normal(kb, (DIM, 1), jnp.float32)
    mean = 0.1 * jax.random.normal(km, (DIM, 1), jnp.float32)
    var = 1.0 + 0.1 * jnp.abs(jax.random.normal(kv, (DIM, 1), jnp.float32))
    scale = gamma / jnp.sqrt(var + BN_EPS)
    shift = beta - mean * scale
    return scale, shift


def make_params(key):
    keys = jax.random.split(key, 10)
    wstd = 1.0 / jnp.sqrt(jnp.float32(DIM))
    p = {
        "wq": wstd * jax.random.normal(keys[0], (DIM, DIM), jnp.float32),
        "wk": wstd * jax.random.normal(keys[1], (DIM, DIM), jnp.float32),
        "wv": wstd * jax.random.normal(keys[2], (DIM, DIM), jnp.float32),
        "wp": wstd * jax.random.normal(keys[3], (DIM, DIM), jnp.float32),
        "bp": 0.1 * jax.random.normal(keys[4], (DIM, 1), jnp.float32),
    }
    p["q_scale"], p["q_shift"] = _fold_bn(keys[5])
    p["k_scale"], p["k_shift"] = _fold_bn(keys[6])
    p["v_scale"], p["v_shift"] = _fold_bn(keys[7])
    p["p_scale"], p["p_shift"] = _fold_bn(keys[8])
    return p


# --------------------------------- main ---------------------------------------
if __name__ == "__main__":
    T, B, H, W = 2, 2, 8, 8
    key = jax.random.PRNGKey(0)
    kx, kp = jax.random.split(key)
    x = 2.0 * jax.random.normal(kx, (T, B, DIM, H, W), jnp.float32)
    params = make_params(kp)

    out = jax.block_until_ready(jax.jit(spiking_self_attention)(x, params))
    assert out.shape == (T, B, DIM, W, H), out.shape
    assert bool(jnp.all(jnp.isfinite(out)))
    # Output of the final LIF layer is binary spikes.
    assert bool(jnp.all((out == 0.0) | (out == 1.0)))

    # Pure-JAX reference. Matmul rounding-order differences can flip the rare
    # spike whose membrane lands essentially on the threshold, so compare the
    # mismatch *fraction* (structural bugs give ~0.2+).
    ref = jax.block_until_ready(jax.jit(_reference)(x, params))
    mismatch = float(jnp.mean(jnp.abs(out - ref)))
    assert mismatch < 0.05, f"spike mismatch fraction {mismatch}"

    print("KERNEL_OK")
</pallas_src>

<mosaic_0001>
module attributes {stable_mosaic.version = 11 : i64} {
  func.func @_ssa_kernel(%arg0: i32, %arg1: memref<1x2x32x128xf32, #tpu.memory_space<vmem>>, %arg2: memref<96x32xf32, #tpu.memory_space<vmem>>, %arg3: memref<96x1xf32, #tpu.memory_space<vmem>>, %arg4: memref<32x32xf32, #tpu.memory_space<vmem>>, %arg5: memref<32x1xf32, #tpu.memory_space<vmem>>, %arg6: memref<32x64xf32, #tpu.memory_space<vmem>>, %arg7: memref<1x2x32x128xbf16, #tpu.memory_space<vmem>>, %arg8: memref<96x128xf32, #tpu.memory_space<vmem>>, %arg9: memref<32x128xf32, #tpu.memory_space<vmem>>, %arg10: memref<32x128xf32, #tpu.memory_space<vmem>>) attributes {dimension_semantics = [#tpu.dimension_semantics<parallel>], iteration_bounds = array<i64: 1>, scalar_prefetch = 0 : i64, scratch_operands = 3 : i64, tpu.core_type = #tpu.core_type<tc>, window_params = [{transform_indices = @transform_0, window_bounds = array<i64: 1, 2, 32, 128>}, {pipeline_mode = #tpu.pipeline_mode<synchronous>, transform_indices = @transform_1, window_bounds = array<i64: 96, 32>}, {pipeline_mode = #tpu.pipeline_mode<synchronous>, transform_indices = @transform_2, window_bounds = array<i64: 96, 1>}, {pipeline_mode = #tpu.pipeline_mode<synchronous>, transform_indices = @transform_3, window_bounds = array<i64: 32, 32>}, {pipeline_mode = #tpu.pipeline_mode<synchronous>, transform_indices = @transform_4, window_bounds = array<i64: 32, 1>}, {pipeline_mode = #tpu.pipeline_mode<synchronous>, transform_indices = @transform_5, window_bounds = array<i64: 32, 64>}, {transform_indices = @transform_6, window_bounds = array<i64: 1, 2, 32, 128>}]} {
    %cst = arith.constant 0.000000e+00 : f32
    %0 = vector.broadcast %cst : f32 to vector<96x128xf32>
    %c0 = arith.constant 0 : index
    %c0_0 = arith.constant 0 : index
    %1 = vector.load %arg8[%c0, %c0_0] : memref<96x128xf32, #tpu.memory_space<vmem>>, vector<96x128xf32>
    tpu.vector_store %arg8[%c0, %c0_0], %0 {strides = array<i32>} : memref<96x128xf32, #tpu.memory_space<vmem>>, vector<96x128xf32>,
    %cst_1 = arith.constant 0.000000e+00 : f32
    %2 = vector.broadcast %cst_1 : f32 to vector<32x128xf32>
    %c0_2 = arith.constant 0 : index
    %c0_3 = arith.constant 0 : index
    %3 = vector.load %arg9[%c0_2, %c0_3] : memref<32x128xf32, #tpu.memory_space<vmem>>, vector<32x128xf32>
    tpu.vector_store %arg9[%c0_2, %c0_3], %2 {strides = array<i32>} : memref<32x128xf32, #tpu.memory_space<vmem>>, vector<32x128xf32>,
    %cst_4 = arith.constant 0.000000e+00 : f32
    %4 = vector.broadcast %cst_4 : f32 to vector<32x128xf32>
    %c0_5 = arith.constant 0 : index
    %c0_6 = arith.constant 0 : index
    %5 = vector.load %arg10[%c0_5, %c0_6] : memref<32x128xf32, #tpu.memory_space<vmem>>, vector<32x128xf32>
    tpu.vector_store %arg10[%c0_5, %c0_6], %4 {strides = array<i32>} : memref<32x128xf32, #tpu.memory_space<vmem>>, vector<32x128xf32>,
    %c0_7 = arith.constant 0 : index
    %c0_8 = arith.constant 0 : index
    %6 = vector.load %arg2[%c0_7, %c0_8] : memref<96x32xf32, #tpu.memory_space<vmem>>, vector<96x32xf32>
    %c0_9 = arith.constant 0 : index
    %c0_10 = arith.constant 0 : index
    %7 = vector.load %arg4[%c0_9, %c0_10] : memref<32x32xf32, #tpu.memory_space<vmem>>, vector<32x32xf32>
    %c0_11 = arith.constant 0 : index
    %c0_12 = arith.constant 0 : index
    %8 = vector.load %arg3[%c0_11, %c0_12] : memref<96x1xf32, #tpu.memory_space<vmem>>, vector<96x1xf32>
    %9 = vector.shape_cast %8 : vector<96x1xf32> to vector<96x1xf32>
    %10 = vector.broadcast %9 : vector<96x1xf32> to vector<96x128xf32>
    %c0_13 = arith.constant 0 : index
    %c0_14 = arith.constant 0 : index
    %11 = vector.load %arg5[%c0_13, %c0_14] : memref<32x1xf32, #tpu.memory_space<vmem>>, vector<32x1xf32>
    %12 = vector.shape_cast %11 : vector<32x1xf32> to vector<32x1xf32>
    %13 = vector.broadcast %12 : vector<32x1xf32> to vector<32x128xf32>
    %c0_15 = arith.constant 0 : index
    %c0_16 = arith.constant 0 : index
    %14 = vector.load %arg6[%c0_15, %c0_16] : memref<32x64xf32, #tpu.memory_space<vmem>>, vector<32x64xf32>
    %15 = tpu.iota {dimensions = array<i32: 2>} : vector<2x1x128xi32>
    %16 = tpu.iota {dimensions = array<i32: 0>} : vector<2x1x128xi32>
    %c64_i32 = arith.constant 64 : i32
    %17 = vector.broadcast %c64_i32 : i32 to vector<2x1x128xi32>
    %18 = arith.muli %16, %17 : vector<2x1x128xi32>
    %19 = arith.cmpi sge, %15, %18 : vector<2x1x128xi32>
    %c64_i32_17 = arith.constant 64 : i32
    %20 = vector.broadcast %c64_i32_17 : i32 to vector<2x1x128xi32>
    %21 = arith.addi %18, %20 : vector<2x1x128xi32>
    %22 = arith.cmpi slt, %15, %21 : vector<2x1x128xi32>
    %23 = arith.andi %19, %22 : vector<2x1x128xi1>
    %24 = arith.extui %23 : vector<2x1x128xi1> to vector<2x1x128xi32>
    %25 = arith.sitofp %24 : vector<2x1x128xi32> to vector<2x1x128xf32>
    %26 = arith.truncf %25 : vector<2x1x128xf32> to vector<2x1x128xbf16>
    %c0_i32 = arith.constant 0 : i32
    %c0_18 = arith.constant 0 : index
    %27 = arith.index_cast %c0_i32 : i32 to index
    %c0_19 = arith.constant 0 : index
    %c0_20 = arith.constant 0 : index
    %28 = vector.load %arg1[%c0_18, %27, %c0_19, %c0_20] : memref<1x2x32x128xf32, #tpu.memory_space<vmem>>, vector<1x1x32x128xf32>
    %29 = vector.shape_cast %28 : vector<1x1x32x128xf32> to vector<32x128xf32>
    %cst_21 = arith.constant dense<0.000000e+00> : vector<96x128xf32>
    %30 = tpu.matmul %6, %29, %cst_21 {dimension_numbers = #tpu.dot_dimension_numbers<[1], [0], [0], [1], [0, 0, 1, 1], [], []>} : vector<96x32xf32>, vector<32x128xf32>, vector<96x128xf32> -> vector<96x128xf32>
    %31 = arith.addf %30, %10 : vector<96x128xf32>
    %c0_22 = arith.constant 0 : index
    %c0_23 = arith.constant 0 : index
    %32 = vector.load %arg8[%c0_22, %c0_23] : memref<96x128xf32, #tpu.memory_space<vmem>>, vector<96x128xf32>
    %33 = arith.subf %31, %32 : vector<96x128xf32>
    %cst_24 = arith.constant 5.000000e-01 : f32
    %34 = vector.broadcast %cst_24 : f32 to vector<96x128xf32>
    %35 = arith.mulf %33, %34 : vector<96x128xf32>
    %36 = arith.addf %32, %35 : vector<96x128xf32>
    %cst_25 = arith.constant 1.000000e+00 : f32
    %37 = vector.broadcast %cst_25 : f32 to vector<96x128xf32>
    %38 = arith.cmpf oge, %36, %37 : vector<96x128xf32>
    %cst_26 = arith.constant 0.000000e+00 : f32
    %39 = vector.broadcast %cst_26 : f32 to vector<96x128xf32>
    %40 = arith.select %38, %39, %36 : vector<96x128xi1>, vector<96x128xf32>
    %c0_27 = arith.constant 0 : index
    %c0_28 = arith.constant 0 : index
    %41 = vector.load %arg8[%c0_27, %c0_28] : memref<96x128xf32, #tpu.memory_space<vmem>>, vector<96x128xf32>
    tpu.vector_store %arg8[%c0_27, %c0_28], %40 {strides = array<i32>} : memref<96x128xf32, #tpu.memory_space<vmem>>, vector<96x128xf32>,
    %42 = arith.extui %38 : vector<96x128xi1> to vector<96x128xi32>
    %43 = arith.sitofp %42 : vector<96x128xi32> to vector<96x128xf32>
    %44 = arith.truncf %43 : vector<96x128xf32> to vector<96x128xbf16>
    %45 = vector.extract_strided_slice %44 {offsets = [0, 0], sizes = [32, 128], strides = [1, 1]} : vector<96x128xbf16> to vector<32x128xbf16>
    %46 = vector.extract_strided_slice %44 {offsets = [32, 0], sizes = [32, 128], strides = [1, 1]} : vector<96x128xbf16> to vector<32x128xbf16>
    %47 = vector.extract_strided_slice %44 {offsets = [64, 0], sizes = [32, 128], strides = [1, 1]} : vector<96x128xbf16> to vector<32x128xbf16>
    %48 = vector.shape_cast %46 : vector<32x128xbf16> to vector<1x32x128xbf16>
    %49 = vector.broadcast %48 : vector<1x32x128xbf16> to vector<2x32x128xbf16>
    %50 = vector.broadcast %26 : vector<2x1x128xbf16> to vector<2x32x128xbf16>
    %51 = arith.mulf %49, %50 : vector<2x32x128xbf16>
    %52 = vector.shape_cast %51 : vector<2x32x128xbf16> to vector<64x128xbf16>
    %53 = vector.shape_cast %45 : vector<32x128xbf16> to vector<1x32x128xbf16>
    %54 = vector.broadcast %53 : vector<1x32x128xbf16> to vector<2x32x128xbf16>
    %55 = vector.broadcast %26 : vector<2x1x128xbf16> to vector<2x32x128xbf16>
    %56 = arith.mulf %54, %55 : vector<2x32x128xbf16>
    %57 = vector.shape_cast %56 : vector<2x32x128xbf16> to vector<64x128xbf16>
    %cst_29 = arith.constant dense<0.000000e+00> : vector<32x64xf32>
    %58 = tpu.matmul %47, %52, %cst_29 {dimension_numbers = #tpu.dot_dimension_numbers<[1], [1], [0], [0], [0, 0, 1, 0], [], []>} : vector<32x128xbf16>, vector<64x128xbf16>, vector<32x64xf32> -> vector<32x64xf32>
    %59 = arith.mulf %58, %14 : vector<32x64xf32>
    %60 = arith.truncf %59 : vector<32x64xf32> to vector<32x64xbf16>
    %cst_30 = arith.constant dense<0.000000e+00> : vector<32x128xf32>
    %61 = tpu.matmul %60, %57, %cst_30 {dimension_numbers = #tpu.dot_dimension_numbers<[1], [0], [0], [1], [0, 0, 1, 1], [], []>} : vector<32x64xbf16>, vector<64x128xbf16>, vector<32x128xf32> -> vector<32x128xf32>
    %c0_31 = arith.constant 0 : index
    %c0_32 = arith.constant 0 : index
    %62 = vector.load %arg9[%c0_31, %c0_32] : memref<32x128xf32, #tpu.memory_space<vmem>>, vector<32x128xf32>
    %63 = arith.subf %61, %62 : vector<32x128xf32>
    %cst_33 = arith.constant 5.000000e-01 : f32
    %64 = vector.broadcast %cst_33 : f32 to vector<32x128xf32>
    %65 = arith.mulf %63, %64 : vector<32x128xf32>
    %66 = arith.addf %62, %65 : vector<32x128xf32>
    %cst_34 = arith.constant 1.000000e+00 : f32
    %67 = vector.broadcast %cst_34 : f32 to vector<32x128xf32>
    %68 = arith.cmpf oge, %66, %67 : vector<32x128xf32>
    %cst_35 = arith.constant 0.000000e+00 : f32
    %69 = vector.broadcast %cst_35 : f32 to vector<32x128xf32>
    %70 = arith.select %68, %69, %66 : vector<32x128xi1>, vector<32x128xf32>
    %c0_36 = arith.constant 0 : index
    %c0_37 = arith.constant 0 : index
    %71 = vector.load %arg9[%c0_36, %c0_37] : memref<32x128xf32, #tpu.memory_space<vmem>>, vector<32x128xf32>
    tpu.vector_store %arg9[%c0_36, %c0_37], %70 {strides = array<i32>} : memref<32x128xf32, #tpu.memory_space<vmem>>, vector<32x128xf32>,
    %72 = arith.extui %68 : vector<32x128xi1> to vector<32x128xi32>
    %73 = arith.sitofp %72 : vector<32x128xi32> to vector<32x128xf32>
    %cst_38 = arith.constant dense<0.000000e+00> : vector<32x128xf32>
    %74 = tpu.matmul %7, %73, %cst_38 {dimension_numbers = #tpu.dot_dimension_numbers<[1], [0], [0], [1], [0, 0, 1, 1], [], []>} : vector<32x32xf32>, vector<32x128xf32>, vector<32x128xf32> -> vector<32x128xf32>
    %75 = arith.addf %74, %13 : vector<32x128xf32>
    %c0_39 = arith.constant 0 : index
    %c0_40 = arith.constant 0 : index
    %76 = vector.load %arg10[%c0_39, %c0_40] : memref<32x128xf32, #tpu.memory_space<vmem>>, vector<32x128xf32>
    %77 = arith.subf %75, %76 : vector<32x128xf32>
    %cst_41 = arith.constant 5.000000e-01 : f32
    %78 = vector.broadcast %cst_41 : f32 to vector<32x128xf32>
    %79 = arith.mulf %77, %78 : vector<32x128xf32>
    %80 = arith.addf %76, %79 : vector<32x128xf32>
    %cst_42 = arith.constant 1.000000e+00 : f32
    %81 = vector.broadcast %cst_42 : f32 to vector<32x128xf32>
    %82 = arith.cmpf oge, %80, %81 : vector<32x128xf32>
    %cst_43 = arith.constant 0.000000e+00 : f32
    %83 = vector.broadcast %cst_43 : f32 to vector<32x128xf32>
    %84 = arith.select %82, %83, %80 : vector<32x128xi1>, vector<32x128xf32>
    %c0_44 = arith.constant 0 : index
    %c0_45 = arith.constant 0 : index
    %85 = vector.load %arg10[%c0_44, %c0_45] : memref<32x128xf32, #tpu.memory_space<vmem>>, vector<32x128xf32>
    tpu.vector_store %arg10[%c0_44, %c0_45], %84 {strides = array<i32>} : memref<32x128xf32, #tpu.memory_space<vmem>>, vector<32x128xf32>,
    %86 = arith.extui %82 : vector<32x128xi1> to vector<32x128xi32>
    %87 = arith.sitofp %86 : vector<32x128xi32> to vector<32x128xf32>
    %88 = arith.truncf %87 : vector<32x128xf32> to vector<32x128xbf16>
    %c0_46 = arith.constant 0 : index
    %89 = arith.index_cast %c0_i32 : i32 to index
    %c0_47 = arith.constant 0 : index
    %c0_48 = arith.constant 0 : index
    %90 = vector.load %arg7[%c0_46, %89, %c0_47, %c0_48] : memref<1x2x32x128xbf16, #tpu.memory_space<vmem>>, vector<1x1x32x128xbf16>
    %91 = vector.shape_cast %90 : vector<1x1x32x128xbf16> to vector<32x128xbf16>
    %92 = vector.shape_cast %88 : vector<32x128xbf16> to vector<1x1x32x128xbf16>
    tpu.vector_store %arg7[%c0_46, %89, %c0_47, %c0_48], %92 {strides = array<i32>} : memref<1x2x32x128xbf16, #tpu.memory_space<vmem>>, vector<1x1x32x128xbf16>,
    %c1_i32 = arith.constant 1 : i32
    %c0_49 = arith.constant 0 : index
    %93 = arith.index_cast %c1_i32 : i32 to index
    %c0_50 = arith.constant 0 : index
    %c0_51 = arith.constant 0 : index
    %94 = vector.load %arg1[%c0_49, %93, %c0_50, %c0_51] : memref<1x2x32x128xf32, #tpu.memory_space<vmem>>, vector<1x1x32x128xf32>
    %95 = vector.shape_cast %94 : vector<1x1x32x128xf32> to vector<32x128xf32>
    %cst_52 = arith.constant dense<0.000000e+00> : vector<96x128xf32>
    %96 = tpu.matmul %6, %95, %cst_52 {dimension_numbers = #tpu.dot_dimension_numbers<[1], [0], [0], [1], [0, 0, 1, 1], [], []>} : vector<96x32xf32>, vector<32x128xf32>, vector<96x128xf32> -> vector<96x128xf32>
    %97 = arith.addf %96, %10 : vector<96x128xf32>
    %c0_53 = arith.constant 0 : index
    %c0_54 = arith.constant 0 : index
    %98 = vector.load %arg8[%c0_53, %c0_54] : memref<96x128xf32, #tpu.memory_space<vmem>>, vector<96x128xf32>
    %99 = arith.subf %97, %98 : vector<96x128xf32>
    %cst_55 = arith.constant 5.000000e-01 : f32
    %100 = vector.broadcast %cst_55 : f32 to vector<96x128xf32>
    %101 = arith.mulf %99, %100 : vector<96x128xf32>
    %102 = arith.addf %98, %101 : vector<96x128xf32>
    %cst_56 = arith.constant 1.000000e+00 : f32
    %103 = vector.broadcast %cst_56 : f32 to vector<96x128xf32>
    %104 = arith.cmpf oge, %102, %103 : vector<96x128xf32>
    %cst_57 = arith.constant 0.000000e+00 : f32
    %105 = vector.broadcast %cst_57 : f32 to vector<96x128xf32>
    %106 = arith.select %104, %105, %102 : vector<96x128xi1>, vector<96x128xf32>
    %c0_58 = arith.constant 0 : index
    %c0_59 = arith.constant 0 : index
    %107 = vector.load %arg8[%c0_58, %c0_59] : memref<96x128xf32, #tpu.memory_space<vmem>>, vector<96x128xf32>
    tpu.vector_store %arg8[%c0_58, %c0_59], %106 {strides = array<i32>} : memref<96x128xf32, #tpu.memory_space<vmem>>, vector<96x128xf32>,
    %108 = arith.extui %104 : vector<96x128xi1> to vector<96x128xi32>
    %109 = arith.sitofp %108 : vector<96x128xi32> to vector<96x128xf32>
    %110 = arith.truncf %109 : vector<96x128xf32> to vector<96x128xbf16>
    %111 = vector.extract_strided_slice %110 {offsets = [0, 0], sizes = [32, 128], strides = [1, 1]} : vector<96x128xbf16> to vector<32x128xbf16>
    %112 = vector.extract_strided_slice %110 {offsets = [32, 0], sizes = [32, 128], strides = [1, 1]} : vector<96x128xbf16> to vector<32x128xbf16>
    %113 = vector.extract_strided_slice %110 {offsets = [64, 0], sizes = [32, 128], strides = [1, 1]} : vector<96x128xbf16> to vector<32x128xbf16>
    %114 = vector.shape_cast %112 : vector<32x128xbf16> to vector<1x32x128xbf16>
    %115 = vector.broadcast %114 : vector<1x32x128xbf16> to vector<2x32x128xbf16>
    %116 = vector.broadcast %26 : vector<2x1x128xbf16> to vector<2x32x128xbf16>
    %117 = arith.mulf %115, %116 : vector<2x32x128xbf16>
    %118 = vector.shape_cast %117 : vector<2x32x128xbf16> to vector<64x128xbf16>
    %119 = vector.shape_cast %111 : vector<32x128xbf16> to vector<1x32x128xbf16>
    %120 = vector.broadcast %119 : vector<1x32x128xbf16> to vector<2x32x128xbf16>
    %121 = vector.broadcast %26 : vector<2x1x128xbf16> to vector<2x32x128xbf16>
    %122 = arith.mulf %120, %121 : vector<2x32x128xbf16>
    %123 = vector.shape_cast %122 : vector<2x32x128xbf16> to vector<64x128xbf16>
    %cst_60 = arith.constant dense<0.000000e+00> : vector<32x64xf32>
    %124 = tpu.matmul %113, %118, %cst_60 {dimension_numbers = #tpu.dot_dimension_numbers<[1], [1], [0], [0], [0, 0, 1, 0], [], []>} : vector<32x128xbf16>, vector<64x128xbf16>, vector<32x64xf32> -> vector<32x64xf32>
    %125 = arith.mulf %124, %14 : vector<32x64xf32>
    %126 = arith.truncf %125 : vector<32x64xf32> to vector<32x64xbf16>
    %cst_61 = arith.constant dense<0.000000e+00> : vector<32x128xf32>
    %127 = tpu.matmul %126, %123, %cst_61 {dimension_numbers = #tpu.dot_dimension_numbers<[1], [0], [0], [1], [0, 0, 1, 1], [], []>} : vector<32x64xbf16>, vector<64x128xbf16>, vector<32x128xf32> -> vector<32x128xf32>
    %c0_62 = arith.constant 0 : index
    %c0_63 = arith.constant 0 : index
    %128 = vector.load %arg9[%c0_62, %c0_63] : memref<32x128xf32, #tpu.memory_space<vmem>>, vector<32x128xf32>
    %129 = arith.subf %127, %128 : vector<32x128xf32>
    %cst_64 = arith.constant 5.000000e-01 : f32
    %130 = vector.broadcast %cst_64 : f32 to vector<32x128xf32>
    %131 = arith.mulf %129, %130 : vector<32x128xf32>
    %132 = arith.addf %128, %131 : vector<32x128xf32>
    %cst_65 = arith.constant 1.000000e+00 : f32
    %133 = vector.broadcast %cst_65 : f32 to vector<32x128xf32>
    %134 = arith.cmpf oge, %132, %133 : vector<32x128xf32>
    %cst_66 = arith.constant 0.000000e+00 : f32
    %135 = vector.broadcast %cst_66 : f32 to vector<32x128xf32>
    %136 = arith.select %134, %135, %132 : vector<32x128xi1>, vector<32x128xf32>
    %c0_67 = arith.constant 0 : index
    %c0_68 = arith.constant 0 : index
    %137 = vector.load %arg9[%c0_67, %c0_68] : memref<32x128xf32, #tpu.memory_space<vmem>>, vector<32x128xf32>
    tpu.vector_store %arg9[%c0_67, %c0_68], %136 {strides = array<i32>} : memref<32x128xf32, #tpu.memory_space<vmem>>, vector<32x128xf32>,
    %138 = arith.extui %134 : vector<32x128xi1> to vector<32x128xi32>
    %139 = arith.sitofp %138 : vector<32x128xi32> to vector<32x128xf32>
    %cst_69 = arith.constant dense<0.000000e+00> : vector<32x128xf32>
    %140 = tpu.matmul %7, %139, %cst_69 {dimension_numbers = #tpu.dot_dimension_numbers<[1], [0], [0], [1], [0, 0, 1, 1], [], []>} : vector<32x32xf32>, vector<32x128xf32>, vector<32x128xf32> -> vector<32x128xf32>
    %141 = arith.addf %140, %13 : vector<32x128xf32>
    %c0_70 = arith.constant 0 : index
    %c0_71 = arith.constant 0 : index
    %142 = vector.load %arg10[%c0_70, %c0_71] : memref<32x128xf32, #tpu.memory_space<vmem>>, vector<32x128xf32>
    %143 = arith.subf %141, %142 : vector<32x128xf32>
    %cst_72 = arith.constant 5.000000e-01 : f32
    %144 = vector.broadcast %cst_72 : f32 to vector<32x128xf32>
    %145 = arith.mulf %143, %144 : vector<32x128xf32>
    %146 = arith.addf %142, %145 : vector<32x128xf32>
    %cst_73 = arith.constant 1.000000e+00 : f32
    %147 = vector.broadcast %cst_73 : f32 to vector<32x128xf32>
    %148 = arith.cmpf oge, %146, %147 : vector<32x128xf32>
    %cst_74 = arith.constant 0.000000e+00 : f32
    %149 = vector.broadcast %cst_74 : f32 to vector<32x128xf32>
    %150 = arith.select %148, %149, %146 : vector<32x128xi1>, vector<32x128xf32>
    %c0_75 = arith.constant 0 : index
    %c0_76 = arith.constant 0 : index
    %151 = vector.load %arg10[%c0_75, %c0_76] : memref<32x128xf32, #tpu.memory_space<vmem>>, vector<32x128xf32>
    tpu.vector_store %arg10[%c0_75, %c0_76], %150 {strides = array<i32>} : memref<32x128xf32, #tpu.memory_space<vmem>>, vector<32x128xf32>,
    %152 = arith.extui %148 : vector<32x128xi1> to vector<32x128xi32>
    %153 = arith.sitofp %152 : vector<32x128xi32> to vector<32x128xf32>
    %154 = arith.truncf %153 : vector<32x128xf32> to vector<32x128xbf16>
    %c0_77 = arith.constant 0 : index
    %155 = arith.index_cast %c1_i32 : i32 to index
    %c0_78 = arith.constant 0 : index
    %c0_79 = arith.constant 0 : index
    %156 = vector.load %arg7[%c0_77, %155, %c0_78, %c0_79] : memref<1x2x32x128xbf16, #tpu.memory_space<vmem>>, vector<1x1x32x128xbf16>
    %157 = vector.shape_cast %156 : vector<1x1x32x128xbf16> to vector<32x128xbf16>
    %158 = vector.shape_cast %154 : vector<32x128xbf16> to vector<1x1x32x128xbf16>
    tpu.vector_store %arg7[%c0_77, %155, %c0_78, %c0_79], %158 {strides = array<i32>} : memref<1x2x32x128xbf16, #tpu.memory_space<vmem>>, vector<1x1x32x128xbf16>,
    %c2_i32 = arith.constant 2 : i32
    return
  }
  func.func @transform_0(%arg0: i32) -> (i32, i32, i32, i32) {
    %c0_i32 = arith.constant 0 : i32
    %c0_i32_0 = arith.constant 0 : i32
    %c0_i32_1 = arith.constant 0 : i32
    %c0_i32_2 = arith.constant 0 : i32
    return %arg0, %c0_i32, %c0_i32_0, %c0_i32_1 : i32, i32, i32, i32
  }
  func.func @transform_1(%arg0: i32) -> (i32, i32) {
    %c0_i32 = arith.constant 0 : i32
    %c0_i32_0 = arith.constant 0 : i32
    %c0_i32_1 = arith.constant 0 : i32
    return %c0_i32, %c0_i32_0 : i32, i32
  }
  func.func @transform_2(%arg0: i32) -> (i32, i32) {
    %c0_i32 = arith.constant 0 : i32
    %c0_i32_0 = arith.constant 0 : i32
    %c0_i32_1 = arith.constant 0 : i32
    return %c0_i32, %c0_i32_0 : i32, i32
  }
  func.func @transform_3(%arg0: i32) -> (i32, i32) {
    %c0_i32 = arith.constant 0 : i32
    %c0_i32_0 = arith.constant 0 : i32
    %c0_i32_1 = arith.constant 0 : i32
    return %c0_i32, %c0_i32_0 : i32, i32
  }
  func.func @transform_4(%arg0: i32) -> (i32, i32) {
    %c0_i32 = arith.constant 0 : i32
    %c0_i32_0 = arith.constant 0 : i32
    %c0_i32_1 = arith.constant 0 : i32
    return %c0_i32, %c0_i32_0 : i32, i32
  }
  func.func @transform_5(%arg0: i32) -> (i32, i32) {
    %c0_i32 = arith.constant 0 : i32
    %c0_i32_0 = arith.constant 0 : i32
    %c0_i32_1 = arith.constant 0 : i32
    return %c0_i32, %c0_i32_0 : i32, i32
  }
  func.func @transform_6(%arg0: i32) -> (i32, i32, i32, i32) {
    %c0_i32 = arith.constant 0 : i32
    %c0_i32_0 = arith.constant 0 : i32
    %c0_i32_1 = arith.constant 0 : i32
    %c0_i32_2 = arith.constant 0 : i32
    return %arg0, %c0_i32, %c0_i32_0, %c0_i32_1 : i32, i32, i32, i32
  }
}

</mosaic_0001>

<bundles_post_ra>
// kernel: tile.9
= control target key start
LH: loop header
LB: loop body
LE: loop exit
PB: predicated region body
PF: predicated region fallthrough
CT: control target
= control target key end

     0   :  { %vm162_vm0 = vcmask 1047556   ;;  %s304_s10 = smov 32   ;;  %vm164_vm1 = vcmask 261120   ;;  %vm201_vm2 = vcmask 523520   ;;  %s451_s0 = inlined_call_operand.vmem [shape: f32[32,2,32], index: 0, kind: input, shape index: {}]   ;;  %s452_s1 = inlined_call_operand.vmem [shape: f32[32,64], index: 1, kind: output, shape index: {}]  }
   0x1   :  { %v290_v0 = vld [vmem:[%s451_s0 + $0xe] sm:$0x3]  ;;  %v291_v1 = vld [vmem:[%s451_s0 + $0xc] sm:$0x3]  ;;  %v292_v2 = vld [vmem:[%s451_s0 + $0xa] sm:$0x3] }
   0x2   :  { %128 = vst [vmem:[#allocation0 + $0x38] sm:$0x3] %v290_v0  ;;  %133 = vst [vmem:[#allocation0 + $0x30] sm:$0x3] %v291_v1  ;;  %v293_v3 = vld [vmem:[%s451_s0 + $0x8] sm:$0x3] }
   0x3   :  { %138 = vst [vmem:[#allocation0 + $0x28] sm:$0x3] %v292_v2  ;;  %v294_v4 = vld [vmem:[%s451_s0 + $0x6] sm:$0x3]  ;;  %v295_v5 = vld [vmem:[%s451_s0 + $0x4] sm:$0x3] }
   0x4   :  { %143 = vst [vmem:[#allocation0 + $0x20] sm:$0x3] %v293_v3  ;;  %148 = vst [vmem:[#allocation0 + $0x18] sm:$0x3] %v294_v4  ;;  %v296_v6 = vld [vmem:[%s451_s0 + $0x2] sm:$0x3] }
   0x5   :  { %153 = vst [vmem:[#allocation0 + $0x10] sm:$0x3] %v295_v5  ;;  %v158_v7 = vld [vmem:[%s451_s0] sm:$0x3]  ;;  %157 = vst [vmem:[#allocation0 + $0x8] sm:$0x3] %v296_v6 }
   0x6   :  { %159 = vst [vmem:[#allocation0] sm:$0x3] %v158_v7  ;;  %v274_v8 = vld [vmem:[%s451_s0 + $0x2e] sm:$0x3]  ;;  %v275_v9 = vld [vmem:[%s451_s0 + $0x2c] sm:$0x3] }
   0x7   :  { %v276_v10 = vld [vmem:[%s451_s0 + $0x2a] sm:$0x3]  ;;  %48 = vst [vmem:[#allocation0 + $0xb8] sm:$0x3] %v274_v8  ;;  %53 = vst [vmem:[#allocation0 + $0xb0] sm:$0x3] %v275_v9 }
   0x8   :  { %58 = vst [vmem:[#allocation0 + $0xa8] sm:$0x3] %v276_v10  ;;  %v277_v11 = vld [vmem:[%s451_s0 + $0x28] sm:$0x3]  ;;  %v278_v12 = vld [vmem:[%s451_s0 + $0x26] sm:$0x3] }
   0x9   :  { %v279_v13 = vld [vmem:[%s451_s0 + $0x24] sm:$0x3]  ;;  %63 = vst [vmem:[#allocation0 + $0xa0] sm:$0x3] %v277_v11  ;;  %68 = vst [vmem:[#allocation0 + $0x98] sm:$0x3] %v278_v12 }
   0xa   :  { %73 = vst [vmem:[#allocation0 + $0x90] sm:$0x3] %v279_v13  ;;  %v280_v14 = vld [vmem:[%s451_s0 + $0x22] sm:$0x3]  ;;  %v281_v15 = vld [vmem:[%s451_s0 + $0x20] sm:$0x3] }
   0xb   :  { %v282_v16 = vld [vmem:[%s451_s0 + $0x1e] sm:$0x3]  ;;  %78 = vst [vmem:[#allocation0 + $0x88] sm:$0x3] %v280_v14  ;;  %83 = vst [vmem:[#allocation0 + $0x80] sm:$0x3] %v281_v15 }
   0xc   :  { %88 = vst [vmem:[#allocation0 + $0x78] sm:$0x3] %v282_v16  ;;  %v283_v17 = vld [vmem:[%s451_s0 + $0x1c] sm:$0x3]  ;;  %v284_v18 = vld [vmem:[%s451_s0 + $0x1a] sm:$0x3] }
   0xd   :  { %v285_v19 = vld [vmem:[%s451_s0 + $0x18] sm:$0x3]  ;;  %93 = vst [vmem:[#allocation0 + $0x70] sm:$0x3] %v283_v17  ;;  %98 = vst [vmem:[#allocation0 + $0x68] sm:$0x3] %v284_v18 }
   0xe   :  { %103 = vst [vmem:[#allocation0 + $0x60] sm:$0x3] %v285_v19  ;;  %v286_v20 = vld [vmem:[%s451_s0 + $0x16] sm:$0x3]  ;;  %v287_v21 = vld [vmem:[%s451_s0 + $0x14] sm:$0x3] }
   0xf   :  { %v288_v22 = vld [vmem:[%s451_s0 + $0x12] sm:$0x3]  ;;  %108 = vst [vmem:[#allocation0 + $0x58] sm:$0x3] %v286_v20  ;;  %113 = vst [vmem:[#allocation0 + $0x50] sm:$0x3] %v287_v21 }
  0x10   :  { %118 = vst [vmem:[#allocation0 + $0x48] sm:$0x3] %v288_v22  ;;  %v289_v23 = vld [vmem:[%s451_s0 + $0x10] sm:$0x3]  ;;  %v266_v24 = vld [vmem:[%s451_s0 + $0x3e] sm:$0x3] }
  0x11   :  { %v267_v25 = vld [vmem:[%s451_s0 + $0x3c] sm:$0x3]  ;;  %v196_v26 = vld [vmem:[#allocation0 + $0x1] ss:$8 sm:$0xf0]  }
  0x12   :  { %123 = vst [vmem:[#allocation0 + $0x40] sm:$0x3] %v289_v23  ;;  %8 = vst [vmem:[#allocation0 + $0xf8] sm:$0x3] %v266_v24  ;;  %v268_v27 = vld [vmem:[%s451_s0 + $0x3a] sm:$0x3] }
  0x13   :  { %13 = vst [vmem:[#allocation0 + $0xf0] sm:$0x3] %v267_v25  ;;  %v194_v28 = vld [vmem:[#allocation0 + $0x1] ss:$8 sm:$0xf]  }
  0x14   :  { %18 = vst [vmem:[#allocation0 + $0xe8] sm:$0x3] %v268_v27  ;;  %v269_v29 = vld [vmem:[%s451_s0 + $0x38] sm:$0x3]  ;;  %v198_v30 = vsel %vm162_vm0, %v196_v26, %v194_v28  ;;  %v270_v31 = vld [vmem:[%s451_s0 + $0x36] sm:$0x3] }
  0x15   :  { %23 = vst [vmem:[#allocation0 + $0xe0] sm:$0x3] %v269_v29  ;;  %v271_v32 = vld [vmem:[%s451_s0 + $0x34] sm:$0x3]  ;;  %v272_v33 = vld [vmem:[%s451_s0 + $0x32] sm:$0x3]  ;;  %199 = vrot.lane.b32.xlu0 %v198_v30, %s304_s10 }
  0x16   :  { %v217_v34 = vld [vmem:[#allocation0 + $0x81] ss:$8 sm:$0xf0]   ;;  %28 = vst [vmem:[#allocation0 + $0xd8] sm:$0x3] %v270_v31 }
  0x17   :  { %33 = vst [vmem:[#allocation0 + $0xd0] sm:$0x3] %v271_v32  ;;  %38 = vst [vmem:[#allocation0 + $0xc8] sm:$0x3] %v272_v33  ;;  %v273_v35 = vld [vmem:[%s451_s0 + $0x30] sm:$0x3] }
  0x18   :  { %v215_v36 = vld [vmem:[#allocation0 + $0x81] ss:$8 sm:$0xf]   ;;  %43 = vst [vmem:[#allocation0 + $0xc0] sm:$0x3] %v273_v35 }
  0x19   :  { %v160_v37 = vld [vmem:[#allocation0] ss:$8 sm:$0xf]   ;;  %v219_v38 = vsel %vm162_vm0, %v217_v34, %v215_v36  ;;  %v206_v39 = vld [vmem:[#allocation0 + $0x41] ss:$8 sm:$0xf0]  }
  0x1a   :  { %v161_v40 = vld [vmem:[#allocation0] ss:$8 sm:$0xf0]   ;;  %220 = vrot.lane.b32.xlu1 %v219_v38, %s304_s10  ;;  %v204_v44 = vld [vmem:[#allocation0 + $0x41] ss:$8 sm:$0xf]  }
  0x1b   :  { %v163_v41 = vsel %vm162_vm0, %v161_v40, %v160_v37  ;;  %v176_v42 = vld [vmem:[#allocation0 + $0x80] ss:$8 sm:$0xf]   ;;  %v208_v47 = vsel %vm162_vm0, %v206_v39, %v204_v44 }
  0x1c   :  { %v178_v43 = vld [vmem:[#allocation0 + $0x80] ss:$8 sm:$0xf0]   ;;  %165 = vst.msk [vmem:[%s452_s1] sm:$0xff] %vm164_vm1, %v163_v41   ;;  %209 = vrot.lane.b32.xlu0 %v208_v47, %s304_s10 }
  0x1d   :  { %v180_v45 = vsel %vm162_vm0, %v178_v43, %v176_v42  ;;  %v167_v46 = vld [vmem:[#allocation0 + $0x40] ss:$8 sm:$0xf]   ;;  %v228_v49 = vld [vmem:[#allocation0 + $0xc1] ss:$8 sm:$0xf0]  }
  0x1e   :  { %298 = vst.msk [vmem:[%s452_s1 + $0x10] sm:$0xff] %vm164_vm1, %v180_v45   ;;  %v169_v48 = vld [vmem:[#allocation0 + $0x40] ss:$8 sm:$0xf0]  }
  0x1f   :  { %v171_v50 = vsel %vm162_vm0, %v169_v48, %v167_v46  ;;  %v187_v51 = vld [vmem:[#allocation0 + $0xc0] ss:$8 sm:$0xf0]   ;;  %v226_v52 = vld [vmem:[#allocation0 + $0xc1] ss:$8 sm:$0xf]  }
  0x20   :  { %297 = vst.msk [vmem:[%s452_s1 + $0x8] sm:$0xff] %vm164_vm1, %v171_v50   ;;  %v185_v53 = vld [vmem:[#allocation0 + $0xc0] ss:$8 sm:$0xf]   ;;  %v230_v54 = vsel %vm162_vm0, %v228_v49, %v226_v52 }
  0x21   :  { %v189_v55 = vsel %vm162_vm0, %v187_v51, %v185_v53  ;;  %231 = vrot.lane.b32.xlu1 %v230_v54, %s304_s10 }
  0x22   :  { %299 = vst.msk [vmem:[%s452_s1 + $0x18] sm:$0xff] %vm164_vm1, %v189_v55  }
  0x87   :  { %v200_v56 = vpop.permute.xlu0 %199  }
  0x88   :  { %202 = vst.msk [vmem:[%s452_s1] sm:$0xff] %vm201_vm2, %v200_v56  }
  0x8c   :  { %v221_v57 = vpop.permute.xlu1 %220  }
  0x8d   :  { %301 = vst.msk [vmem:[%s452_s1 + $0x10] sm:$0xff] %vm201_vm2, %v221_v57  }
  0x8e   :  { %v210_v58 = vpop.permute.xlu0 %209  }
  0x8f   :  { %300 = vst.msk [vmem:[%s452_s1 + $0x8] sm:$0xff] %vm201_vm2, %v210_v58  }
  0x93   :  { %v232_v59 = vpop.permute.xlu1 %231  }
  0x94   :  { %302 = vst.msk [vmem:[%s452_s1 + $0x18] sm:$0xff] %vm201_vm2, %v232_v59  }

// kernel: mul.36
= control target key start
LH: loop header
LB: loop body
LE: loop exit
PB: predicated region body
PF: predicated region fallthrough
CT: control target
= control target key end

     0   :  { %s34_s0 = inlined_call_operand.vmem [shape: f32[32,1], index: 0, kind: input, shape index: {}]   ;;  %s35_s1 = inlined_call_operand.vmem [shape: f32[32,1], index: 1, kind: input, shape index: {}]   ;;  %s36_s2 = inlined_call_operand.vmem [shape: f32[32,1], index: 2, kind: output, shape index: {}]  }
   0x1   :  { %v3_v0 = vld [vmem:[%s34_s0] sm:$0x1] }
   0x2   :  { %v4_v1 = vld [vmem:[%s35_s1] sm:$0x1] }
   0x3   :  { %v7_v2 = vmul.f32 %v4_v1, %v3_v0 }
   0x5   :  { %9 = vst [vmem:[%s36_s2] sm:$0x1] %v7_v2 }

// kernel: spiking_self_attention.1
= control target key start
LH: loop header
LB: loop body
LE: loop exit
PB: predicated region body
PF: predicated region fallthrough
CT: control target
= control target key end

     0   :  { %vm178_vm0 = vcmask 261120   ;;  %v1676_v3 = vmov 0   ;;  %v160_v43 = vlaneseq  ;;  %v1677_v55 = vmov 0.0   ;;  %s2192_s0 = inlined_call_operand.vmem [shape: f32[1,2,32,128], index: 0, kind: input, shape index: {}]   ;;  %s2193_s1 = inlined_call_operand.vmem [shape: f32[96,32], index: 1, kind: input, shape index: {}]   ;;  %s2194_s2 = inlined_call_operand.vmem [shape: f32[96,1], index: 2, kind: input, shape index: {}]   ;;  %s2195_s4 = inlined_call_operand.vmem [shape: f32[32,1], index: 4, kind: input, shape index: {}]   ;;  %s2196_s5 = inlined_call_operand.vmem [shape: f32[32,64], index: 5, kind: input, shape index: {}]   ;;  %s2197_s3 = inlined_call_operand.vmem [shape: f32[32,32], index: 3, kind: input, shape index: {}]   ;;  %s2198_s6 = inlined_call_operand.vmem [shape: bf16[1,2,32,128], index: 6, kind: output, shape index: {}]  }
   0x1   :  { %v174_v0 = vld [vmem:[%s2192_s0] sm:$0xff]  ;;  %v175_v1 = vld [vmem:[%s2192_s0 + $0x8] sm:$0xff]  ;;  %v176_v2 = vld [vmem:[%s2192_s0 + $0x10] sm:$0xff]  ;;  %1674 = vset.pattern.permute.xlu0 %v1676_v3  ;;  %1675 = vset.pattern.permute.xlu1 %v1676_v3 }
   0x2   :  { %v1639_v4 = vpack.c.bf16 %v175_v1, %v174_v0  ;;  %v177_v5 = vld [vmem:[%s2192_s0 + $0x18] sm:$0xff]  ;;  %v1729_v6 = vld [vmem:[%s2193_s1] sm:$0xff]  ;;  %v66_v9 = vld [vmem:[%s2194_s2 + $0x30] sm:$0xff]  ;;  %v161_v45 = vand.u32 127, %v160_v43 }
   0x3   :  { %v1643_v7 = vpack.c.bf16 %v177_v5, %v176_v2  ;;  %1519 = vmatprep.mubr.msk.f32.mxu0 %vm178_vm0, %v1729_v6  ;;  %v64_v8 = vld [vmem:[%s2194_s2 + $0x20] sm:$0xff]  ;;  %v65_v10 = vld [vmem:[%s2194_s2 + $0x28] sm:$0xff]  ;;  %104 = vperm.xlu1 %1675, %v66_v9   ;;  %v67_v12 = vld [vmem:[%s2194_s2 + $0x38] sm:$0xff] }
   0x4   :  { %1640 = vmatprep.subr.bf16.mxu0 %v1639_v4  ;;  %94 = vperm.xlu0 %1674, %v64_v8   ;;  %v1745_v11 = vld [vmem:[%s2193_s1 + $0x8] sm:$0xff]  ;;  %v1753_v13 = vld [vmem:[%s2193_s1 + $0x10] sm:$0xff]  ;;  %v68_v14 = vld [vmem:[%s2194_s2 + $0x40] sm:$0xff]  ;;  %vm164_vm1 = vcmp.lt.s32.totalorder %v161_v45, 64  ;;  %vm163_vm3 = vcmp.ge.s32.totalorder %v161_v45, 64 }
   0x5   :  { %1642 = vmatpush3.bf16.msra.mxu0 %v1639_v4  ;;  %v1765_v15 = vld [vmem:[%s2193_s1 + $0x18] sm:$0xff]  ;;  %v69_v16 = vld [vmem:[%s2194_s2 + $0x48] sm:$0xff]  ;;  %v1773_v17 = vld [vmem:[%s2193_s1 + $0x20] sm:$0xff]  ;;  %v1306_v56 = vsel %vm164_vm1, 1.0, %v1677_v55  ;;  %v1307_v9 = vsel %vm163_vm3, 1.0, %v1677_v55 }
   0x6   :  { %1644 = vmatprep.subr.bf16.mxu0 %v1643_v7  ;;  %v70_v18 = vld [vmem:[%s2194_s2 + $0x50] sm:$0xff]  ;;  %v1785_v19 = vld [vmem:[%s2193_s1 + $0x28] sm:$0xff]  ;;  %v71_v20 = vld [vmem:[%s2194_s2 + $0x58] sm:$0xff]  ;;  %v1893_v2 = vpack.c.bf16 %v1306_v56, %v1306_v56 }
   0x7   :  { %109 = vperm.xlu1 %1675, %v67_v12   ;;  %v1793_v21 = vld [vmem:[%s2193_s1 + $0x30] sm:$0xff]  ;;  %v60_v22 = vld [vmem:[%s2194_s2] sm:$0xff]  ;;  %v1805_v23 = vld [vmem:[%s2193_s1 + $0x38] sm:$0xff] }
   0x8   :  { %99 = vperm.xlu0 %1674, %v65_v10   ;;  %v61_v24 = vld [vmem:[%s2194_s2 + $0x8] sm:$0xff]  ;;  %v1813_v25 = vld [vmem:[%s2193_s1 + $0x40] sm:$0xff]  ;;  %v62_v26 = vld [vmem:[%s2194_s2 + $0x10] sm:$0xff] }
   0x9   :  { %1646 = vmatpush3.bf16.msra.mxu0 %v1643_v7  ;;  %v1825_v27 = vld [vmem:[%s2193_s1 + $0x48] sm:$0xff]  ;;  %v63_v28 = vld [vmem:[%s2194_s2 + $0x18] sm:$0xff]  ;;  %v1833_v29 = vld [vmem:[%s2193_s1 + $0x50] sm:$0xff] }
   0xa   :  { %v132_v30 = vld [vmem:[%s2195_s4] sm:$0xff]  ;;  %v1845_v31 = vld [vmem:[%s2193_s1 + $0x58] sm:$0xff]  ;;  %v133_v32 = vld [vmem:[%s2195_s4 + $0x8] sm:$0xff] }
   0xb   :  { %119 = vperm.xlu1 %1675, %v69_v16   ;;  %v134_v33 = vld [vmem:[%s2195_s4 + $0x10] sm:$0xff]  ;;  %v135_v34 = vld [vmem:[%s2195_s4 + $0x18] sm:$0xff] }
   0xc   :  { %1520 = vmatmul.mubr.msk.f32.vlgmr.msra.gmra.mrb[0].mxu0 %vm178_vm0, %v1745_v11  ;;  %114 = vperm.xlu0 %1674, %v68_v14  }
   0xd   :  { %1522 = vmatprep.mubr.msk.f32.mxu0 %vm178_vm0, %v1753_v13 }
   0xf   :  { %129 = vperm.xlu1 %1675, %v71_v20  }
  0x10   :  { %1523 = vmatmul.mubr.msk.f32.gmra.mrb[2].mxu0 %vm178_vm0, %v1765_v15  ;;  %124 = vperm.xlu0 %1674, %v70_v18  }
  0x11   :  { %1525 = vmatprep.mubr.msk.f32.mxu0 %vm178_vm0, %v1773_v17 }
  0x13   :  { %79 = vperm.xlu1 %1675, %v61_v24  }
  0x14   :  { %1526 = vmatmul.mubr.msk.f32.gmra.mrb[4].mxu0 %vm178_vm0, %v1785_v19  ;;  %74 = vperm.xlu0 %1674, %v60_v22  }
  0x15   :  { %1528 = vmatprep.mubr.msk.f32.mxu0 %vm178_vm0, %v1793_v21 }
  0x17   :  { %89 = vperm.xlu1 %1675, %v63_v28  }
  0x18   :  { %1529 = vmatmul.mubr.msk.f32.gmra.mrb[6].mxu0 %vm178_vm0, %v1805_v23  ;;  %84 = vperm.xlu0 %1674, %v62_v26  }
  0x19   :  { %1531 = vmatprep.mubr.msk.f32.mxu0 %vm178_vm0, %v1813_v25 }
  0x1b   :  { %143 = vperm.xlu1 %1675, %v133_v32  }
  0x1c   :  { %1532 = vmatmul.mubr.msk.f32.gmra.mrb[8].mxu0 %vm178_vm0, %v1825_v27  ;;  %138 = vperm.xlu0 %1674, %v132_v30  }
  0x1d   :  { %1534 = vmatprep.mubr.msk.f32.mxu0 %vm178_vm0, %v1833_v29 }
  0x1f   :  { %153 = vperm.xlu1 %1675, %v135_v34  }
  0x20   :  { %1535 = vmatmul.mubr.msk.f32.gmra.mrb[10].mxu0 %vm178_vm0, %v1845_v31  ;;  %148 = vperm.xlu0 %1674, %v134_v33   ;;  %v1906_v33 = vpack.c.bf16 %v1307_v9, %v1307_v9 }
  0x82   :  { %v1858_v35 = vpop.permute.xlu1 %104 }
  0x83   :  { %v1860_v36 = vpop.permute.xlu0 %94 }
  0x86   :  { %v1862_v37 = vpop.permute.xlu1 %109 }
  0x87   :  { %v1864_v38 = vpop.permute.xlu0 %99 }
  0x8a   :  { %v1866_v39 = vpop.permute.xlu1 %119 }
  0x8b   :  { %v1868_v40 = vpop.permute.xlu0 %114 }
  0x8e   :  { %v1870_v41 = vpop.permute.xlu1 %129 }
  0x8f   :  { %v1872_v42 = vpop.permute.xlu0 %124 }
  0x92   :  { %v1874_v44 = vpop.permute.xlu1 %79 }
  0x93   :  { %v1876_v46 = vpop.permute.xlu0 %74 }
  0x96   :  { %v1880_v51 = vpop.permute.xlu1 %89 }
  0x97   :  { %v1883_v57 = vpop.permute.xlu0 %84 }
  0xdf   :  { %v1521_v47 = vpop.f32.mrb[0].mxu0 }
  0xe0   :  { %v287_v48 = vadd.f32 %v1521_v47, %v1874_v44  ;;  %v281_v49 = vpop.f32.mrb[1].mxu0 }
  0xe1   :  { %v282_v50 = vadd.f32 %v281_v49, %v1876_v46 }
  0xe2   :  { %v365_v52 = vmul.f32 0.5, %v287_v48 }
  0xe3   :  { %v364_v53 = vmul.f32 0.5, %v282_v50  ;;  %v1524_v54 = vpop.f32.mrb[2].mxu0 }
  0xe4   :  { %vm389_vm2 = vcmp.ge.f32.partialorder %v365_v52, 1.0  ;;  %v297_v58 = vadd.f32 %v1524_v54, %v1880_v51  ;;  %v291_v59 = vpop.f32.mrb[3].mxu0 }
  0xe5   :  { %v1886_v60 = vsel %vm389_vm2, 0.0, %v365_v52  ;;  %v1321_v61 = vsel %vm389_vm2, 1.0, %v1677_v55  ;;  %vm388_vm4 = vcmp.ge.f32.partialorder %v364_v53, 1.0  ;;  %v292_v62 = vadd.f32 %v291_v59, %v1883_v57 }
  0xe6   :  { %v1890_v63 = vsel %vm388_vm4, 0.0, %v364_v53  ;;  %v1320_v0 = vsel %vm388_vm4, 1.0, %v1677_v55  ;;  %v367_v1 = vmul.f32 0.5, %v297_v58  ;;  %vm517_vm2 = vcmask 523264  }
  0xe7   :  { %v448_v3 = vpack.c.bf16 %v1321_v61, %v1320_v0  ;;  %v366_v4 = vmul.f32 0.5, %v292_v62  ;;  %v1527_v5 = vpop.f32.mrb[4].mxu0 }
  0xe8   :  { %vm391_vm5 = vcmp.ge.f32.partialorder %v367_v1, 1.0  ;;  %v307_v7 = vadd.f32 %v1527_v5, %v1864_v38  ;;  %v301_v8 = vpop.f32.mrb[5].mxu0 }
  0xe9   :  { %v1897_v10 = vsel %vm391_vm5, 0.0, %v367_v1  ;;  %v1323_v12 = vsel %vm391_vm5, 1.0, %v1677_v55  ;;  %vm390_vm6 = vcmp.ge.f32.partialorder %v366_v4, 1.0  ;;  %v302_v14 = vadd.f32 %v301_v8, %v1860_v36 }
  0xea   :  { %v1901_v16 = vsel %vm390_vm6, 0.0, %v366_v4  ;;  %v1322_v18 = vsel %vm390_vm6, 1.0, %v1677_v55  ;;  %v369_v20 = vmul.f32 0.5, %v307_v7  ;;  %v458_v22 = vmul.bf16 %v448_v3, %v1893_v2 }
  0xeb   :  { %v449_v24 = vpack.c.bf16 %v1323_v12, %v1322_v18  ;;  %v368_v26 = vmul.f32 0.5, %v302_v14  ;;  %v1530_v28 = vpop.f32.mrb[6].mxu0  ;;  %v460_v59 = vmul.bf16 %v448_v3, %v1906_v33 }
  0xec   :  { %vm393_vm7 = vcmp.ge.f32.partialorder %v369_v20, 1.0  ;;  %v317_v30 = vadd.f32 %v1530_v28, %v1862_v37  ;;  %1549 = vmatprep.subr.bf16.mxu0 %v458_v22  ;;  %v311_v32 = vpop.f32.mrb[7].mxu0 }
  0xed   :  { %v1908_v34 = vsel %vm393_vm7, 0.0, %v369_v20  ;;  %v1325_v43 = vsel %vm393_vm7, 1.0, %v1677_v55  ;;  %vm392_vm8 = vcmp.ge.f32.partialorder %v368_v26, 1.0  ;;  %v312_v45 = vadd.f32 %v311_v32, %v1858_v35  ;;  %1550 = vmatpush3.bf16.msra.mxu0 %v458_v22 }
  0xee   :  { %v1912_v47 = vsel %vm392_vm8, 0.0, %v368_v26  ;;  %v1324_v48 = vsel %vm392_vm8, 1.0, %v1677_v55  ;;  %v371_v49 = vmul.f32 0.5, %v317_v30  ;;  %v459_v50 = vmul.bf16 %v449_v24, %v1893_v2 }
  0xef   :  { %v370_v52 = vmul.f32 0.5, %v312_v45  ;;  %v1533_v53 = vpop.f32.mrb[8].mxu0  ;;  %v450_v54 = vpack.c.bf16 %v1325_v43, %v1324_v48  ;;  %v461_v18 = vmul.bf16 %v449_v24, %v1906_v33  ;;  %v1678_v43 = vmov 1.0|1.0  }
  0xf0   :  { %vm395_vm9 = vcmp.ge.f32.partialorder %v371_v49, 1.0  ;;  %v327_v56 = vadd.f32 %v1533_v53, %v1866_v39  ;;  %1551 = vmatprep.subr.bf16.mxu0 %v459_v50  ;;  %v321_v58 = vpop.f32.mrb[9].mxu0 }
  0xf1   :  { %v1918_v61 = vsel %vm395_vm9, 0.0, %v371_v49  ;;  %v1327_v62 = vsel %vm395_vm9, 1.0, %v1677_v55  ;;  %vm394_vm10 = vcmp.ge.f32.partialorder %v370_v52, 1.0  ;;  %v322_v0 = vadd.f32 %v321_v58, %v1868_v40  ;;  %1552 = vmatpush3.bf16.msra.mxu0 %v459_v50  ;;  %v1358_v50 = vld [vmem:[%s2192_s0 + $0x20] sm:$0xff] }
  0xf2   :  { %v1922_v1 = vsel %vm394_vm10, 0.0, %v370_v52  ;;  %v1326_v4 = vsel %vm394_vm10, 1.0, %v1677_v55  ;;  %v373_v5 = vmul.f32 0.5, %v327_v56  ;;  %1553 = vmatprep.subr.bf16.mxu0 %v460_v59  ;;  %v454_v7 = vmul.bf16 %v450_v54, %v1893_v2  ;;  %v1359_v52 = vld [vmem:[%s2192_s0 + $0x28] sm:$0xff]  ;;  %v1361_v56 = vld [vmem:[%s2192_s0 + $0x38] sm:$0xff] }
  0xf3   :  { %v451_v8 = vpack.c.bf16 %v1327_v62, %v1326_v4  ;;  %v372_v9 = vmul.f32 0.5, %v322_v0  ;;  %v1536_v12 = vpop.f32.mrb[10].mxu0  ;;  %v456_v48 = vmul.bf16 %v450_v54, %v1906_v33  ;;  %v1655_v53 = vpack.c.bf16 %v1359_v52, %v1358_v50  ;;  %v1360_v54 = vld [vmem:[%s2192_s0 + $0x30] sm:$0xff] }
  0xf4   :  { %v337_v3 = vadd.f32 %v1536_v12, %v1870_v41  ;;  %1537 = vmatprep.subr.bf16.mxu1 %v454_v7  ;;  %v331_v14 = vpop.f32.mrb[11].mxu0  ;;  %vm397_vm11 = vcmp.ge.f32.partialorder %v373_v5, 1.0  ;;  %v1659_v58 = vpack.c.bf16 %v1361_v56, %v1360_v54 }
  0xf5   :  { %v332_v20 = vadd.f32 %v331_v14, %v1872_v42  ;;  %1538 = vmatpush3.bf16.xpose.msra.mxu1 %v454_v7  ;;  %1554 = vmatpush3.bf16.msra.mxu0 %v460_v59  ;;  %v455_v22 = vmul.bf16 %v451_v8, %v1893_v2  ;;  %vm396_vm12 = vcmp.ge.f32.partialorder %v372_v9, 1.0  ;;  %v1930_v26 = vsel %vm397_vm11, 0.0, %v373_v5 }
  0xf6   :  { %v375_v28 = vmul.f32 0.5, %v337_v3  ;;  %1555 = vmatprep.subr.bf16.mxu0 %v461_v18  ;;  %v1932_v30 = vsel %vm396_vm12, 0.0, %v372_v9  ;;  %vm1332_vm13 = vmpackc.low %vm397_vm11, %vm396_vm12  ;;  %v457_v49 = vmul.bf16 %v451_v8, %v1906_v33 }
  0xf7   :  { %v374_v32 = vmul.f32 0.5, %v332_v20  ;;  %1539 = vmatprep.subr.bf16.mxu1 %v455_v22  ;;  %1545 = vmatprep.mubr.msk.bf16.mxu1 %vm1332_vm13, %v1678_v43 }
  0xf8   :  { %vm399_vm14 = vcmp.ge.f32.partialorder %v375_v28, 1.0 }
  0xf9   :  { %v1935_v24 = vsel %vm399_vm14, 0.0, %v375_v28  ;;  %vm398_vm15 = vcmp.ge.f32.partialorder %v374_v32, 1.0  ;;  %1556 = vmatpush3.bf16.msra.mxu0 %v461_v18 }
  0xfa   :  { %v1937_v45 = vsel %vm398_vm15, 0.0, %v374_v32  ;;  %vm1334_vm1 = vmpackc.low %vm399_vm14, %vm398_vm15 }
  0xfd   :  { %1540 = vmatpush3.bf16.xpose.msra.mxu1 %v455_v22 }
  0xfe   :  { %1541 = vmatprep.subr.bf16.mxu1 %v456_v48 }
 0x105   :  { %1542 = vmatpush3.bf16.xpose.msra.mxu1 %v456_v48 }
 0x106   :  { %1543 = vmatprep.subr.bf16.mxu1 %v457_v49 }
 0x10d   :  { %1544 = vmatpush3.bf16.xpose.msra.mxu1 %v457_v49 }
 0x10e   :  { %1656 = vmatprep.subr.bf16.mxu1 %v1655_v53 }
 0x114   :  { %1546 = vmatmul.mubr.msk.bf16.vlgmr.msra.gmra.mrb[0].mxu1 %vm1334_vm1, %v1678_v43 }
 0x115   :  { %1658 = vmatpush3.bf16.msra.mxu1 %v1655_v53  ;;  %1583 = vmatprep.mubr.msk.f32.mxu1 %vm178_vm0, %v1729_v6  ;;  %v1981_v6 = vld [vmem:[%s2196_s5 + $0x10] sm:$0xff] }
 0x116   :  { %1660 = vmatprep.subr.bf16.mxu1 %v1659_v58 }
 0x119   :  { %1662 = vmatpush3.bf16.msra.mxu1 %v1659_v58 }
 0x11c   :  { %1584 = vmatmul.mubr.msk.f32.vlgmr.msra.gmra.mrb[4].mxu1 %vm178_vm0, %v1745_v11 }
 0x11d   :  { %1586 = vmatprep.mubr.msk.f32.mxu1 %vm178_vm0, %v1753_v13  ;;  %v1986_v13 = vld [vmem:[%s2196_s5 + $0x18] sm:$0xff] }
 0x120   :  { %1587 = vmatmul.mubr.msk.f32.gmra.mrb[6].mxu1 %vm178_vm0, %v1765_v15  ;;  %v1991_v15 = vld [vmem:[%s2196_s5] sm:$0xff] }
 0x121   :  { %1589 = vmatprep.mubr.msk.f32.mxu1 %vm178_vm0, %v1773_v17 }
 0x124   :  { %1590 = vmatmul.mubr.msk.f32.gmra.mrb[8].mxu1 %vm178_vm0, %v1785_v19  ;;  %v1996_v19 = vld [vmem:[%s2196_s5 + $0x8] sm:$0xff] }
 0x125   :  { %1592 = vmatprep.mubr.msk.f32.mxu1 %vm178_vm0, %v1793_v21 }
 0x128   :  { %1593 = vmatmul.mubr.msk.f32.gmra.mrb[10].mxu1 %vm178_vm0, %v1805_v23 }
 0x129   :  { %1595 = vmatprep.mubr.msk.f32.mxu1 %vm178_vm0, %v1813_v25 }
 0x12c   :  { %1596 = vmatmul.mubr.msk.f32.gmra.mrb[12].mxu1 %vm178_vm0, %v1825_v27 }
 0x12d   :  { %1598 = vmatprep.mubr.msk.f32.mxu1 %vm178_vm0, %v1833_v29 }
 0x130   :  { %1599 = vmatmul.mubr.msk.f32.gmra.mrb[14].mxu1 %vm178_vm0, %v1845_v31 }
 0x1e7   :  { %v1547_v11 = vpop.f32.mrb[0].mxu1 }
 0x1e8   :  { %v496_v17 = vpop.f32.mrb[1].mxu1  ;;  %v513_v23 = vmul.f32 %v1547_v11, %v1981_v6 }
 0x1e9   :  { %v1548_v21 = vpop.f32.mrb[2].mxu1  ;;  %v511_v29 = vmul.f32 %v496_v17, %v1991_v15 }
 0x1ea   :  { %v514_v25 = vmul.f32 %v1548_v21, %v1986_v13  ;;  %v499_v27 = vpop.f32.mrb[3].mxu1 }
 0x1eb   :  { %v512_v31 = vmul.f32 %v499_v27, %v1996_v19 }
 0x1ec   :  { %v516_v59 = vpack.c.bf16 %v514_v25, %v513_v23 }
 0x1ed   :  { %v515_v62 = vpack.c.bf16 %v512_v31, %v511_v29 }
 0x1ef   :  { %1557 = vmatprep.mubr.msk.bf16.mxu0 %vm517_vm2, %v515_v62  ;;  %v1585_v0 = vpop.f32.mrb[4].mxu1 }
 0x1f0   :  { %v839_v4 = vadd.f32 %v1585_v0, %v1874_v44  ;;  %1558 = vmatmul.mubr.msk.bf16.vlgmr.msra.gmra.mrb[12].mxu0 %vm517_vm2, %v516_v59  ;;  %v833_v5 = vpop.f32.mrb[5].mxu1 }
 0x1f1   :  { %v834_v7 = vadd.f32 %v833_v5, %v1876_v46 }
 0x1f2   :  { %v905_v8 = vsub.f32 %v839_v4, %v1886_v60 }
 0x1f3   :  { %v904_v9 = vsub.f32 %v834_v7, %v1890_v63  ;;  %v1588_v12 = vpop.f32.mrb[6].mxu1 }
 0x1f4   :  { %v917_v3 = vmul.f32 0.5, %v905_v8  ;;  %v849_v14 = vadd.f32 %v1588_v12, %v1880_v51  ;;  %v843_v18 = vpop.f32.mrb[7].mxu1 }
 0x1f5   :  { %v916_v20 = vmul.f32 0.5, %v904_v9  ;;  %v844_v22 = vadd.f32 %v843_v18, %v1883_v57 }
 0x1f6   :  { %v929_v28 = vadd.f32 %v917_v3, %v1886_v60  ;;  %v907_v44 = vsub.f32 %v849_v14, %v1897_v10 }
 0x1f7   :  { %v928_v32 = vadd.f32 %v916_v20, %v1890_v63  ;;  %v906_v46 = vsub.f32 %v844_v22, %v1901_v16  ;;  %v1591_v48 = vpop.f32.mrb[8].mxu1 }
 0x1f8   :  { %vm941_vm3 = vcmp.ge.f32.partialorder %v929_v28, 1.0  ;;  %v919_v49 = vmul.f32 0.5, %v907_v44  ;;  %v859_v50 = vadd.f32 %v1591_v48, %v1864_v38  ;;  %v853_v52 = vpop.f32.mrb[9].mxu1 }
 0x1f9   :  { %v1375_v51 = vsel %vm941_vm3, 1.0, %v1677_v55  ;;  %vm940_vm4 = vcmp.ge.f32.partialorder %v928_v32, 1.0  ;;  %v918_v53 = vmul.f32 0.5, %v906_v46  ;;  %v854_v57 = vadd.f32 %v853_v52, %v1860_v36 }
 0x1fa   :  { %v1374_v60 = vsel %vm940_vm4, 1.0, %v1677_v55  ;;  %v931_v54 = vadd.f32 %v919_v49, %v1897_v10  ;;  %v909_v63 = vsub.f32 %v859_v50, %v1908_v34 }
 0x1fb   :  { %v930_v56 = vadd.f32 %v918_v53, %v1901_v16  ;;  %v908_v58 = vsub.f32 %v854_v57, %v1912_v47  ;;  %v1594_v11 = vpop.f32.mrb[10].mxu1  ;;  %v1000_v17 = vpack.c.bf16 %v1375_v51, %v1374_v60 }
 0x1fc   :  { %vm943_vm5 = vcmp.ge.f32.partialorder %v931_v54, 1.0  ;;  %v921_v38 = vmul.f32 0.5, %v909_v63  ;;  %v869_v21 = vadd.f32 %v1594_v11, %v1862_v37  ;;  %v863_v23 = vpop.f32.mrb[11].mxu1  ;;  %v2065_v54 = vld [vmem:[%s2197_s3] sm:$0xff] }
 0x1fd   :  { %v1377_v25 = vsel %vm943_vm5, 1.0, %v1677_v55  ;;  %vm942_vm6 = vcmp.ge.f32.partialorder %v930_v56, 1.0  ;;  %v920_v36 = vmul.f32 0.5, %v908_v58  ;;  %v864_v27 = vadd.f32 %v863_v23, %v1858_v35  ;;  %1569 = vmatprep.mubr.msk.f32.mxu0 %vm178_vm0, %v2065_v54 }
 0x1fe   :  { %v1376_v10 = vsel %vm942_vm6, 1.0, %v1677_v55  ;;  %v933_v29 = vadd.f32 %v921_v38, %v1908_v34  ;;  %v911_v16 = vsub.f32 %v869_v21, %v1918_v61  ;;  %v1010_v31 = vmul.bf16 %v1000_v17, %v1893_v2 }
 0x1ff   :  { %v932_v59 = vadd.f32 %v920_v36, %v1912_v47  ;;  %v910_v62 = vsub.f32 %v864_v27, %v1922_v1  ;;  %v1597_v37 = vpop.f32.mrb[12].mxu1  ;;  %v1001_v0 = vpack.c.bf16 %v1377_v25, %v1376_v10  ;;  %v1012_v44 = vmul.bf16 %v1000_v17, %v1906_v33  ;;  %v2086_v10 = vld [vmem:[%s2197_s3 + $0x8] sm:$0xff] }
 0x200   :  { %vm945_vm7 = vcmp.ge.f32.partialorder %v933_v29, 1.0  ;;  %v923_v4 = vmul.f32 0.5, %v911_v16  ;;  %v879_v5 = vadd.f32 %v1597_v37, %v1866_v39  ;;  %1613 = vmatprep.subr.bf16.mxu1 %v1010_v31  ;;  %v873_v35 = vpop.f32.mrb[13].mxu1  ;;  %v2091_v29 = vld [vmem:[%s2197_s3 + $0x10] sm:$0xff]  ;;  %v2100_v16 = vld [vmem:[%s2197_s3 + $0x18] sm:$0xff]  ;;  %v2114_v37 = vpop.permute.xlu1 %143 }
 0x201   :  { %v1379_v7 = vsel %vm945_vm7, 1.0, %v1677_v55  ;;  %vm944_vm8 = vcmp.ge.f32.partialorder %v932_v59, 1.0  ;;  %v922_v34 = vmul.f32 0.5, %v910_v62  ;;  %v874_v8 = vadd.f32 %v873_v35, %v1868_v40  ;;  %1614 = vmatpush3.bf16.msra.mxu1 %v1010_v31 }
 0x202   :  { %v1378_v9 = vsel %vm944_vm8, 1.0, %v1677_v55  ;;  %v935_v47 = vadd.f32 %v923_v4, %v1918_v61  ;;  %v913_v12 = vsub.f32 %v879_v5, %v1930_v26  ;;  %v1011_v3 = vmul.bf16 %v1001_v0, %v1893_v2 }
 0x203   :  { %v934_v14 = vadd.f32 %v922_v34, %v1922_v1  ;;  %v912_v39 = vsub.f32 %v874_v8, %v1932_v30  ;;  %v1600_v18 = vpop.f32.mrb[14].mxu1  ;;  %v2040_v20 = vpack.c.bf16 %v1379_v7, %v1378_v9  ;;  %v1013_v53 = vmul.bf16 %v1001_v0, %v1906_v33  ;;  %v2116_v0 = vpop.permute.xlu0 %138 }
 0x204   :  { %vm947_vm9 = vcmp.ge.f32.partialorder %v935_v47, 1.0  ;;  %v925_v22 = vmul.f32 0.5, %v913_v12  ;;  %v889_v40 = vadd.f32 %v1600_v18, %v1870_v41  ;;  %1615 = vmatprep.subr.bf16.mxu1 %v1011_v3  ;;  %v883_v28 = vpop.f32.mrb[15].mxu1  ;;  %v2120_v34 = vpop.permute.xlu1 %153 }
 0x205   :  { %v1381_v61 = vsel %vm947_vm9, 1.0, %v1677_v55  ;;  %vm946_vm10 = vcmp.ge.f32.partialorder %v934_v14, 1.0  ;;  %v924_v32 = vmul.f32 0.5, %v912_v39  ;;  %v884_v46 = vadd.f32 %v883_v28, %v1872_v42  ;;  %1616 = vmatpush3.bf16.msra.mxu1 %v1011_v3 }
 0x206   :  { %v1380_v1 = vsel %vm946_vm10, 1.0, %v1677_v55  ;;  %v915_v48 = vsub.f32 %v889_v40, %v1935_v24  ;;  %1617 = vmatprep.subr.bf16.mxu1 %v1012_v44  ;;  %v937_v49 = vadd.f32 %v925_v22, %v1930_v26  ;;  %v1006_v27 = vmul.bf16 %v2040_v20, %v1893_v2 }
 0x207   :  { %v914_v41 = vsub.f32 %v884_v46, %v1937_v45  ;;  %v936_v50 = vadd.f32 %v924_v32, %v1932_v30  ;;  %v1003_v52 = vpack.c.bf16 %v1381_v61, %v1380_v1  ;;  %v1008_v59 = vmul.bf16 %v2040_v20, %v1906_v33  ;;  %v2122_v9 = vpop.permute.xlu0 %148 }
 0x208   :  { %v927_v51 = vmul.f32 0.5, %v915_v48  ;;  %vm949_vm11 = vcmp.ge.f32.partialorder %v937_v49, 1.0 }
 0x209   :  { %v926_v57 = vmul.f32 0.5, %v914_v41  ;;  %1618 = vmatpush3.bf16.msra.mxu1 %v1012_v44  ;;  %vm948_vm12 = vcmp.ge.f32.partialorder %v936_v50, 1.0  ;;  %v1007_v31 = vmul.bf16 %v1003_v52, %v1893_v2  ;;  %v1009_v62 = vmul.bf16 %v1003_v52, %v1906_v33 }
 0x20a   :  { %v939_v42 = vadd.f32 %v927_v51, %v1935_v24  ;;  %1619 = vmatprep.subr.bf16.mxu1 %v1013_v53  ;;  %vm2053_vm13 = vmpackc.low %vm949_vm11, %vm948_vm12 }
 0x20b   :  { %v938_v26 = vadd.f32 %v926_v57, %v1937_v45 }
 0x20c   :  { %vm951_vm14 = vcmp.ge.f32.partialorder %v939_v42, 1.0 }
 0x20d   :  { %vm950_vm15 = vcmp.ge.f32.partialorder %v938_v26, 1.0  ;;  %1620 = vmatpush3.bf16.msra.mxu1 %v1013_v53 }
 0x20e   :  { %vm2058_vm1 = vmpackc.low %vm951_vm14, %vm950_vm15 }
 0x2c3   :  { %v1559_v24 = vpop.f32.mrb[12].mxu0 }
 0x2c4   :  { %v583_v63 = vmul.f32 0.5, %v1559_v24  ;;  %v558_v56 = vpop.f32.mrb[13].mxu0 }
 0x2c5   :  { %v581_v58 = vmul.f32 0.5, %v558_v56  ;;  %v1560_v45 = vpop.f32.mrb[14].mxu0 }
 0x2c6   :  { %vm591_vm3 = vcmp.ge.f32.partialorder %v583_v63, 1.0  ;;  %v584_v11 = vmul.f32 0.5, %v1560_v45  ;;  %v561_v17 = vpop.f32.mrb[15].mxu0 }
 0x2c7   :  { %vm589_vm4 = vcmp.ge.f32.partialorder %v581_v58, 1.0  ;;  %v582_v38 = vmul.f32 0.5, %v561_v17  ;;  %v2069_v21 = vsel %vm591_vm3, 0.0, %v583_v63 }
 0x2c8   :  { %vm592_vm5 = vcmp.ge.f32.partialorder %v584_v11, 1.0  ;;  %v2071_v23 = vsel %vm589_vm4, 0.0, %v581_v58 }
 0x2c9   :  { %vm590_vm6 = vcmp.ge.f32.partialorder %v582_v38, 1.0  ;;  %vm1651_vm7 = vmpackc.low %vm592_vm5, %vm591_vm3  ;;  %v2073_v25 = vsel %vm592_vm5, 0.0, %v584_v11 }
 0x2ca   :  { %vm1647_vm8 = vmpackc.low %vm590_vm6, %vm589_vm4  ;;  %v2075_v36 = vsel %vm590_vm6, 0.0, %v582_v38 }
 0x2cb   :  { %1648 = vmatprep.subr.msk.bf16.mxu0 %vm1647_vm8, %v1678_v43 }
 0x2cc   :  { %1650 = vmatpush3.bf16.msk.msra.mxu0 %vm1647_vm8, %v1678_v43 }
 0x2cd   :  { %1652 = vmatprep.subr.msk.bf16.mxu0 %vm1651_vm7, %v1678_v43 }
 0x2d0   :  { %1654 = vmatpush3.bf16.msk.msra.mxu0 %vm1651_vm7, %v1678_v43 }
 0x2d1   :  { %1601 = vmatprep.subr.bf16.mxu0 %v1006_v27 }
 0x2d3   :  { %1570 = vmatmul.mubr.msk.f32.vlgmr.msra.gmra.mrb[16].mxu0 %vm178_vm0, %v2086_v10 }
 0x2d4   :  { %1572 = vmatprep.mubr.msk.f32.mxu0 %vm178_vm0, %v2091_v29 }
 0x2d7   :  { %1573 = vmatmul.mubr.msk.f32.gmra.mrb[18].mxu0 %vm178_vm0, %v2100_v16 }
 0x2d8   :  { %1609 = vmatprep.mubr.msk.bf16.mxu0 %vm2053_vm13, %v1678_v43 }
 0x2d9   :  { %1602 = vmatpush3.bf16.xpose.msra.mxu0 %v1006_v27 }
 0x2da   :  { %1603 = vmatprep.subr.bf16.mxu0 %v1007_v31 }
 0x2e1   :  { %1604 = vmatpush3.bf16.xpose.msra.mxu0 %v1007_v31 }
 0x2e2   :  { %1605 = vmatprep.subr.bf16.mxu0 %v1008_v59 }
 0x2e9   :  { %1606 = vmatpush3.bf16.xpose.msra.mxu0 %v1008_v59 }
 0x2ea   :  { %1607 = vmatprep.subr.bf16.mxu0 %v1009_v62 }
 0x2f1   :  { %1608 = vmatpush3.bf16.xpose.msra.mxu0 %v1009_v62 }
 0x2f8   :  { %1610 = vmatmul.mubr.msk.bf16.vlgmr.msra.gmra.mrb[20].mxu0 %vm2058_vm1, %v1678_v43 }
 0x3a6   :  { %v1571_v2 = vpop.f32.mrb[16].mxu0 }
 0x3a7   :  { %v693_v4 = vadd.f32 %v1571_v2, %v2114_v37  ;;  %v687_v5 = vpop.f32.mrb[17].mxu0 }
 0x3a8   :  { %v688_v35 = vadd.f32 %v687_v5, %v2116_v0 }
 0x3a9   :  { %v715_v7 = vmul.f32 0.5, %v693_v4 }
 0x3aa   :  { %v714_v33 = vmul.f32 0.5, %v688_v35  ;;  %v1574_v8 = vpop.f32.mrb[18].mxu0 }
 0x3ab   :  { %vm723_vm9 = vcmp.ge.f32.partialorder %v715_v7, 1.0  ;;  %v703_v47 = vadd.f32 %v1574_v8, %v2120_v34  ;;  %v697_v12 = vpop.f32.mrb[19].mxu0 }
 0x3ac   :  { %v2125_v3 = vsel %vm723_vm9, 0.0, %v715_v7  ;;  %v1351_v14 = vsel %vm723_vm9, 1.0, %v1677_v55  ;;  %vm722_vm10 = vcmp.ge.f32.partialorder %v714_v33, 1.0  ;;  %v698_v39 = vadd.f32 %v697_v12, %v2122_v9 }
 0x3ad   :  { %v2129_v18 = vsel %vm722_vm10, 0.0, %v714_v33  ;;  %v1350_v20 = vsel %vm722_vm10, 1.0, %v1677_v55  ;;  %v717_v22 = vmul.f32 0.5, %v703_v47 }
 0x3ae   :  { %v1425_v40 = vpack.c.bf16 %v1351_v14, %v1350_v20  ;;  %v716_v28 = vmul.f32 0.5, %v698_v39 }
 0x3af   :  { %vm725_vm11 = vcmp.ge.f32.partialorder %v717_v22, 1.0 }
 0x3b0   :  { %1426 = vst [vmem:[%s2198_s6] sm:$0xff] %v1425_v40   ;;  %v2135_v44 = vsel %vm725_vm11, 0.0, %v717_v22  ;;  %v1353_v61 = vsel %vm725_vm11, 1.0, %v1677_v55  ;;  %vm724_vm12 = vcmp.ge.f32.partialorder %v716_v28, 1.0 }
 0x3b1   :  { %v2138_v32 = vsel %vm724_vm12, 0.0, %v716_v28  ;;  %v1352_v46 = vsel %vm724_vm12, 1.0, %v1677_v55 }
 0x3b2   :  { %v1428_v1 = vpack.c.bf16 %v1353_v61, %v1352_v46 }
 0x3b4   :  { %1436 = vst [vmem:[%s2198_s6 + $0x8] sm:$0xff] %v1428_v1  }
 0x3cb   :  { %v1611_v48 = vpop.f32.mrb[20].mxu0 }
 0x3cc   :  { %v1048_v49 = vpop.f32.mrb[21].mxu0  ;;  %v1065_v50 = vmul.f32 %v1611_v48, %v1981_v6 }
 0x3cd   :  { %v1612_v41 = vpop.f32.mrb[22].mxu0  ;;  %v1063_v53 = vmul.f32 %v1048_v49, %v1991_v15 }
 0x3ce   :  { %v1066_v52 = vmul.f32 %v1612_v41, %v1986_v13  ;;  %v1051_v51 = vpop.f32.mrb[23].mxu0 }
 0x3cf   :  { %v1064_v57 = vmul.f32 %v1051_v51, %v1996_v19 }
 0x3d0   :  { %v1068_v42 = vpack.c.bf16 %v1066_v52, %v1065_v50 }
 0x3d1   :  { %v1067_v60 = vpack.c.bf16 %v1064_v57, %v1063_v53 }
 0x3d3   :  { %1621 = vmatprep.mubr.msk.bf16.mxu1 %vm517_vm2, %v1067_v60 }
 0x3d4   :  { %1622 = vmatmul.mubr.msk.bf16.vlgmr.msra.gmra.mrb[16].mxu1 %vm517_vm2, %v1068_v42 }
 0x3d5   :  { %1633 = vmatprep.mubr.msk.f32.mxu1 %vm178_vm0, %v2065_v54 }
 0x4a7   :  { %v1623_v26 = vpop.f32.mrb[16].mxu1 }
 0x4a8   :  { %v1130_v30 = vsub.f32 %v1623_v26, %v2069_v21  ;;  %v1109_v6 = vpop.f32.mrb[17].mxu1 }
 0x4a9   :  { %v1128_v13 = vsub.f32 %v1109_v6, %v2071_v23  ;;  %v1624_v24 = vpop.f32.mrb[18].mxu1 }
 0x4aa   :  { %v1134_v63 = vmul.f32 0.5, %v1130_v30  ;;  %v1131_v15 = vsub.f32 %v1624_v24, %v2073_v25  ;;  %v1112_v19 = vpop.f32.mrb[19].mxu1 }
 0x4ab   :  { %v1132_v56 = vmul.f32 0.5, %v1128_v13  ;;  %v1129_v58 = vsub.f32 %v1112_v19, %v2075_v36 }
 0x4ac   :  { %v1138_v45 = vadd.f32 %v1134_v63, %v2069_v21  ;;  %v1135_v11 = vmul.f32 0.5, %v1131_v15 }
 0x4ad   :  { %v1136_v17 = vadd.f32 %v1132_v56, %v2071_v23  ;;  %v1133_v54 = vmul.f32 0.5, %v1129_v58 }
 0x4ae   :  { %v1139_v38 = vadd.f32 %v1135_v11, %v2073_v25  ;;  %vm1142_vm2 = vcmp.ge.f32.partialorder %v1138_v45, 1.0 }
 0x4af   :  { %v1137_v27 = vadd.f32 %v1133_v54, %v2075_v36  ;;  %vm1140_vm14 = vcmp.ge.f32.partialorder %v1136_v17, 1.0 }
 0x4b0   :  { %vm1143_vm13 = vcmp.ge.f32.partialorder %v1139_v38, 1.0 }
 0x4b1   :  { %vm1141_vm15 = vcmp.ge.f32.partialorder %v1137_v27, 1.0  ;;  %vm1667_vm1 = vmpackc.low %vm1143_vm13, %vm1142_vm2 }
 0x4b2   :  { %vm1663_vm3 = vmpackc.low %vm1141_vm15, %vm1140_vm14 }
 0x4b3   :  { %1664 = vmatprep.subr.msk.bf16.mxu1 %vm1663_vm3, %v1678_v43 }
 0x4b4   :  { %1666 = vmatpush3.bf16.msk.msra.mxu1 %vm1663_vm3, %v1678_v43 }
 0x4b5   :  { %1668 = vmatprep.subr.msk.bf16.mxu1 %vm1667_vm1, %v1678_v43 }
 0x4b8   :  { %1670 = vmatpush3.bf16.msk.msra.mxu1 %vm1667_vm1, %v1678_v43 }
 0x4bb   :  { %1634 = vmatmul.mubr.msk.f32.vlgmr.msra.gmra.mrb[20].mxu1 %vm178_vm0, %v2086_v10 }
 0x4bc   :  { %1636 = vmatprep.mubr.msk.f32.mxu1 %vm178_vm0, %v2091_v29 }
 0x4bf   :  { %1637 = vmatmul.mubr.msk.f32.gmra.mrb[22].mxu1 %vm178_vm0, %v2100_v16 }
 0x58e   :  { %v1635_v21 = vpop.f32.mrb[20].mxu1 }
 0x58f   :  { %v1232_v23 = vadd.f32 %v1635_v21, %v2114_v37  ;;  %v1226_v25 = vpop.f32.mrb[21].mxu1 }
 0x590   :  { %v1227_v36 = vadd.f32 %v1226_v25, %v2116_v0 }
 0x591   :  { %v1250_v31 = vsub.f32 %v1232_v23, %v2125_v3 }
 0x592   :  { %v1249_v59 = vsub.f32 %v1227_v36, %v2129_v18  ;;  %v1638_v43 = vpop.f32.mrb[22].mxu1 }
 0x593   :  { %v1254_v62 = vmul.f32 0.5, %v1250_v31  ;;  %v1242_v10 = vadd.f32 %v1638_v43, %v2120_v34  ;;  %v1236_v2 = vpop.f32.mrb[23].mxu1 }
 0x594   :  { %v1253_v4 = vmul.f32 0.5, %v1249_v59  ;;  %v1237_v29 = vadd.f32 %v1236_v2, %v2122_v9 }
 0x595   :  { %v1258_v16 = vadd.f32 %v1254_v62, %v2125_v3  ;;  %v1252_v5 = vsub.f32 %v1242_v10, %v2135_v44 }
 0x596   :  { %v1257_v37 = vadd.f32 %v1253_v4, %v2129_v18  ;;  %v1251_v0 = vsub.f32 %v1237_v29, %v2138_v32 }
 0x597   :  { %vm1262_vm0 = vcmp.ge.f32.partialorder %v1258_v16, 1.0  ;;  %v1256_v35 = vmul.f32 0.5, %v1252_v5 }
 0x598   :  { %v1405_v7 = vsel %vm1262_vm0, 1.0, %v1677_v55  ;;  %vm1261_vm4 = vcmp.ge.f32.partialorder %v1257_v37, 1.0  ;;  %v1255_v33 = vmul.f32 0.5, %v1251_v0 }
 0x599   :  { %v1404_v34 = vsel %vm1261_vm4, 1.0, %v1677_v55  ;;  %v1260_v8 = vadd.f32 %v1256_v35, %v2135_v44 }
 0x59a   :  { %v1431_v47 = vpack.c.bf16 %v1405_v7, %v1404_v34  ;;  %v1259_v9 = vadd.f32 %v1255_v33, %v2138_v32 }
 0x59b   :  { %vm1264_vm5 = vcmp.ge.f32.partialorder %v1260_v8, 1.0 }
 0x59c   :  { %1437 = vst [vmem:[%s2198_s6 + $0x10] sm:$0xff] %v1431_v47   ;;  %v1407_v12 = vsel %vm1264_vm5, 1.0, %v1677_v55  ;;  %vm1263_vm6 = vcmp.ge.f32.partialorder %v1259_v9, 1.0 }
 0x59d   :  { %v1406_v3 = vsel %vm1263_vm6, 1.0, %v1677_v55 }
 0x59e   :  { %v1434_v14 = vpack.c.bf16 %v1407_v12, %v1406_v3 }
 0x5a0   :  { %1438 = vst [vmem:[%s2198_s6 + $0x18] sm:$0xff] %v1434_v14  }

</bundles_post_ra>
